<compile_context>
chip_gen: v5e
topology: v5e:2x2
jax: 0.10.0
libtpu: 0.0.40
codegen_flags: <defaults>
</compile_context>

<pallas_src>
import functools
import math

import numpy as np
import jax
import jax.numpy as jnp
from jax import lax
from jax.experimental import pallas as pl
from jax.experimental.pallas import tpu as pltpu


# ---------------------------------------------------------------------------
# Parameter construction (mirrors SincConv.__init__, deterministic)
# ---------------------------------------------------------------------------
def _to_mel(hz):
    return 2595.0 * np.log10(1.0 + hz / 700.0)


def _to_hz(mel):
    return 700.0 * (10.0 ** (mel / 2595.0) - 1.0)


def make_sinc_conv_params(out_channels, kernel_size, sample_rate=16000,
                          min_low_hz=50, min_band_hz=50):
    low_hz = 30.0
    high_hz = sample_rate / 2.0 - (min_low_hz + min_band_hz)
    mel = np.linspace(_to_mel(low_hz), _to_mel(high_hz), out_channels + 1)
    hz = _to_hz(mel) / sample_rate
    low_hz_ = jnp.asarray(hz[:-1], dtype=jnp.float32).reshape(-1, 1)        # [C, 1]
    band_hz_ = jnp.asarray(np.diff(hz), dtype=jnp.float32).reshape(-1, 1)   # [C, 1]
    # torch.hamming_window(kernel_size)  (periodic=True default)
    k = np.arange(kernel_size, dtype=np.float64)
    window_ = jnp.asarray(
        0.54 - 0.46 * np.cos(2.0 * np.pi * k / kernel_size),
        dtype=jnp.float32).reshape(1, -1)                                   # [1, K]
    # torch.range(-n, n) / sample_rate  with n = (K-1)/2  (inclusive range)
    n = (kernel_size - 1) / 2.0
    n_ = jnp.asarray((np.arange(kernel_size) - n) / sample_rate,
                     dtype=jnp.float32).reshape(1, -1)                      # [1, K]
    return low_hz_, band_hz_, window_, n_


def _round_up(x, m):
    return (x + m - 1) // m * m


# ---------------------------------------------------------------------------
# Pallas kernel
# ---------------------------------------------------------------------------
def _sinc_conv_kernel(low_hz_ref, band_hz_ref, n_ref, window_ref, x_ref,
                      o_ref, filt_ref, *, kernel_size, sample_rate,
                      min_low_hz, min_band_hz, time_tile):
    K = kernel_size
    T = time_tile
    C = filt_ref.shape[0]
    nb = o_ref.shape[0]

    # ---- build the sinc band-pass filter bank once per batch block --------
    # The scratch persists across the inner ("arbitrary") time axis; t == 0
    # fires once per outer batch step on every core, so this stays correct
    # when the batch axis is sharded across TensorCores ("parallel").
    @pl.when(pl.program_id(1) == 0)
    def _build_filters():
        low = min_low_hz / sample_rate + jnp.abs(low_hz_ref[...])          # [C,1]
        high = low + min_band_hz / sample_rate + jnp.abs(band_hz_ref[...])  # [C,1]
        n = n_ref[...]                                                      # [1,K]
        col = lax.broadcasted_iota(jnp.int32, (C, K), 1)
        center = K // 2

        def sinc(x):
            # Guard the denominator (not just the result) so no NaN is formed.
            safe = jnp.where(col == center, 1.0, x)
            return jnp.where(col == center, 1.0, jnp.sin(safe) / safe)

        two_pi_sr = 2.0 * math.pi * sample_rate
        lp1 = 2.0 * low * sinc(two_pi_sr * (low * n))    # low @ n_ == low * n
        lp2 = 2.0 * high * sinc(two_pi_sr * (high * n))
        band = lp2 - lp1
        band = band / jnp.max(band, axis=1, keepdims=True)
        filt_ref[...] = band * window_ref[...]                              # [C,K]

    # ---- valid 1-D convolution for this (batch block, time tile) ----------
    # Full waveforms are resident in VMEM (constant block index along the
    # time axis); slice the tile window in-kernel at a 128-aligned start.
    start = pl.multiple_of(pl.program_id(1) * T, 128)
    x_win = x_ref[:, pl.ds(start, T + K - 1)]            # [nb, T+K-1]
    filt = filt_ref[...]                                 # [C, K]

    # Tap-accumulate: nb*C*T VPU FMAs per tap; static lane shifts (XLU slot).
    acc = jnp.zeros((nb, C, T), jnp.float32)
    for k in range(K):
        xk = x_win[:, k:k + T]                           # [nb, T]
        acc = acc + filt[None, :, k:k + 1] * xk[:, None, :]
    o_ref[...] = acc.astype(o_ref.dtype)


def sinc_conv(waveforms, low_hz_, band_hz_, window_, n_, *,
              kernel_size, sample_rate=16000, min_low_hz=50, min_band_hz=50,
              stride=1, padding=0, dilation=1, time_tile=None):
    """Forward pass of SincConv.  waveforms: [B, 1, L] -> [B, C, L_out]."""
    assert stride == 1 and dilation == 1, "kernel implements conv1d defaults"
    B, in_ch, L = waveforms.shape
    assert in_ch == 1, "SincConv only supports one input channel"
    C = low_hz_.shape[0]
    K = kernel_size

    L_eff = L + 2 * padding
    L_out = L_eff - K + 1
    assert L_out > 0

    # ---- tiling: lane-dense time tiles (multiple of 128, capped for VMEM) --
    if time_tile is None:
        time_tile = min(1024, _round_up(L_out, 128))
    T = max(128, _round_up(time_tile, 128))
    num_t = pl.cdiv(L_out, T)
    L_out_pad = num_t * T
    L_in_pad = L_out_pad + K - 1

    nb = B if B <= 8 else 8           # batch elements per grid step
    B_pad = _round_up(B, nb)
    num_b = B_pad // nb

    # ---- lay waveforms out as a 2-D [B_pad, L_in_pad] slab (zero padded) ---
    x = waveforms[:, 0, :]
    x = jnp.pad(x, ((0, B_pad - B), (padding, L_in_pad - L - padding)))

    kernel = functools.partial(
        _sinc_conv_kernel, kernel_size=K, sample_rate=sample_rate,
        min_low_hz=min_low_hz, min_band_hz=min_band_hz, time_tile=T)

    out = pl.pallas_call(
        kernel,
        out_shape=jax.ShapeDtypeStruct((B_pad, C, L_out_pad), waveforms.dtype),
        grid_spec=pltpu.PrefetchScalarGridSpec(
            num_scalar_prefetch=0,
            grid=(num_b, num_t),
            in_specs=[
                pl.BlockSpec((C, 1), lambda b, t: (0, 0)),            # low_hz_
                pl.BlockSpec((C, 1), lambda b, t: (0, 0)),            # band_hz_
                pl.BlockSpec((1, K), lambda b, t: (0, 0)),            # n_
                pl.BlockSpec((1, K), lambda b, t: (0, 0)),            # window_
                pl.BlockSpec((nb, L_in_pad), lambda b, t: (b, 0)),    # waveforms
            ],
            out_specs=pl.BlockSpec((nb, C, T), lambda b, t: (b, 0, t)),
            scratch_shapes=[pltpu.VMEM((C, K), jnp.float32)],         # filters
        ),
        compiler_params=pltpu.CompilerParams(
            dimension_semantics=("parallel", "arbitrary")),
    )(low_hz_, band_hz_, n_, window_, x)

    return out[:B, :, :L_out]


# ---------------------------------------------------------------------------
# Pure-JAX reference (for a correctness check)
# ---------------------------------------------------------------------------
def sinc_conv_ref(waveforms, low_hz_, band_hz_, window_, n_, *,
                  kernel_size, sample_rate=16000, min_low_hz=50, min_band_hz=50):
    low = min_low_hz / sample_rate + jnp.abs(low_hz_)
    high = low + min_band_hz / sample_rate + jnp.abs(band_hz_)

    def sinc(x):
        s = jnp.sin(x) / x
        return s.at[:, kernel_size // 2].set(1.0)

    lp1 = 2.0 * low * sinc(2.0 * math.pi * (low @ n_) * sample_rate)
    lp2 = 2.0 * high * sinc(2.0 * math.pi * (high @ n_) * sample_rate)
    band = lp2 - lp1
    band = band / jnp.max(band, axis=1, keepdims=True)
    filters = band * window_                                                 # [C, K]
    return jax.lax.conv_general_dilated(
        waveforms, filters[:, None, :], window_strides=(1,), padding="VALID",
        dimension_numbers=("NCH", "OIH", "NCH"))


# ---------------------------------------------------------------------------
if __name__ == "__main__":
    out_channels = 8
    kernel_size = 25
    sample_rate = 16000
    B, L = 2, 512

    low_hz_, band_hz_, window_, n_ = make_sinc_conv_params(
        out_channels, kernel_size, sample_rate)

    key = jax.random.PRNGKey(0)
    waveforms = jax.random.normal(key, (B, 1, L), dtype=jnp.float32)

    # time_tile=128 exercises the multi-tile path (L_out = 488 -> 4 tiles,
    # padded to 512, lane-dense stores, ragged tail sliced off).
    out = sinc_conv(waveforms, low_hz_, band_hz_, window_, n_,
                    kernel_size=kernel_size, sample_rate=sample_rate,
                    time_tile=128)
    out = jax.block_until_ready(out)

    ref = sinc_conv_ref(waveforms, low_hz_, band_hz_, window_, n_,
                        kernel_size=kernel_size, sample_rate=sample_rate)
    ref = jax.block_until_ready(ref)

    assert out.shape == (B, out_channels, L - kernel_size + 1), out.shape
    np.testing.assert_allclose(np.asarray(out), np.asarray(ref),
                               rtol=1e-4, atol=1e-4)
    print("KERNEL_OK")
</pallas_src>

<mosaic_0001>
module attributes {stable_mosaic.version = 11 : i64} {
  func.func @_sinc_conv_kernel(%arg0: i32, %arg1: i32, %arg2: memref<8x1xf32, #tpu.memory_space<vmem>>, %arg3: memref<8x1xf32, #tpu.memory_space<vmem>>, %arg4: memref<1x25xf32, #tpu.memory_space<vmem>>, %arg5: memref<1x25xf32, #tpu.memory_space<vmem>>, %arg6: memref<2x536xf32, #tpu.memory_space<vmem>>, %arg7: memref<2x8x128xf32, #tpu.memory_space<vmem>>, %arg8: memref<8x25xf32, #tpu.memory_space<vmem>>) attributes {dimension_semantics = [#tpu.dimension_semantics<parallel>, #tpu.dimension_semantics<arbitrary>], iteration_bounds = array<i64: 1, 4>, scalar_prefetch = 0 : i64, scratch_operands = 1 : i64, tpu.core_type = #tpu.core_type<tc>, window_params = [{pipeline_mode = #tpu.pipeline_mode<synchronous>, transform_indices = @transform_0, window_bounds = array<i64: 8, 1>}, {pipeline_mode = #tpu.pipeline_mode<synchronous>, transform_indices = @transform_1, window_bounds = array<i64: 8, 1>}, {pipeline_mode = #tpu.pipeline_mode<synchronous>, transform_indices = @transform_2, window_bounds = array<i64: 1, 25>}, {pipeline_mode = #tpu.pipeline_mode<synchronous>, transform_indices = @transform_3, window_bounds = array<i64: 1, 25>}, {transform_indices = @transform_4, window_bounds = array<i64: 2, 536>}, {transform_indices = @transform_5, window_bounds = array<i64: 2, 8, 128>}]} {
    %c0_i32 = arith.constant 0 : i32
    %0 = arith.cmpi eq, %arg1, %c0_i32 : i32
    %1 = arith.extui %0 : i1 to i32
    %c0_i32_0 = arith.constant 0 : i32
    %2 = arith.cmpi ne, %1, %c0_i32_0 : i32
    scf.if %2 {
      %c0_6 = arith.constant 0 : index
      %c0_7 = arith.constant 0 : index
      %210 = vector.load %arg2[%c0_6, %c0_7] : memref<8x1xf32, #tpu.memory_space<vmem>>, vector<8x1xf32>
      %211 = math.absf %210 : vector<8x1xf32>
      %cst_8 = arith.constant 3.125000e-03 : f32
      %212 = vector.broadcast %cst_8 : f32 to vector<8x1xf32>
      %213 = arith.addf %212, %211 : vector<8x1xf32>
      %cst_9 = arith.constant 3.125000e-03 : f32
      %214 = vector.broadcast %cst_9 : f32 to vector<8x1xf32>
      %215 = arith.addf %213, %214 : vector<8x1xf32>
      %c0_10 = arith.constant 0 : index
      %c0_11 = arith.constant 0 : index
      %216 = vector.load %arg3[%c0_10, %c0_11] : memref<8x1xf32, #tpu.memory_space<vmem>>, vector<8x1xf32>
      %217 = math.absf %216 : vector<8x1xf32>
      %218 = arith.addf %215, %217 : vector<8x1xf32>
      %c0_12 = arith.constant 0 : index
      %c0_13 = arith.constant 0 : index
      %219 = vector.load %arg4[%c0_12, %c0_13] : memref<1x25xf32, #tpu.memory_space<vmem>>, vector<1x25xf32>
      %220 = tpu.iota {dimensions = array<i32: 1>} : vector<8x25xi32>
      %cst_14 = arith.constant 2.000000e+00 : f32
      %221 = vector.broadcast %cst_14 : f32 to vector<8x1xf32>
      %222 = arith.mulf %221, %213 : vector<8x1xf32>
      %223 = vector.broadcast %213 : vector<8x1xf32> to vector<8x25xf32>
      %224 = vector.broadcast %219 : vector<1x25xf32> to vector<8x25xf32>
      %225 = arith.mulf %223, %224 : vector<8x25xf32>
      %cst_15 = arith.constant 100530.969 : f32
      %226 = vector.broadcast %cst_15 : f32 to vector<8x25xf32>
      %227 = arith.mulf %226, %225 : vector<8x25xf32>
      %c12_i32 = arith.constant 12 : i32
      %228 = vector.broadcast %c12_i32 : i32 to vector<8x25xi32>
      %229 = arith.cmpi eq, %220, %228 : vector<8x25xi32>
      %cst_16 = arith.constant 1.000000e+00 : f32
      %230 = vector.broadcast %cst_16 : f32 to vector<8x25xf32>
      %231 = arith.select %229, %230, %227 : vector<8x25xi1>, vector<8x25xf32>
      %c12_i32_17 = arith.constant 12 : i32
      %232 = vector.broadcast %c12_i32_17 : i32 to vector<8x25xi32>
      %233 = arith.cmpi eq, %220, %232 : vector<8x25xi32>
      %234 = math.sin %231 : vector<8x25xf32>
      %235 = arith.divf %234, %231 : vector<8x25xf32>
      %cst_18 = arith.constant 1.000000e+00 : f32
      %236 = vector.broadcast %cst_18 : f32 to vector<8x25xf32>
      %237 = arith.select %233, %236, %235 : vector<8x25xi1>, vector<8x25xf32>
      %238 = vector.broadcast %222 : vector<8x1xf32> to vector<8x25xf32>
      %239 = arith.mulf %238, %237 : vector<8x25xf32>
      %cst_19 = arith.constant 2.000000e+00 : f32
      %240 = vector.broadcast %cst_19 : f32 to vector<8x1xf32>
      %241 = arith.mulf %240, %218 : vector<8x1xf32>
      %242 = vector.broadcast %218 : vector<8x1xf32> to vector<8x25xf32>
      %243 = vector.broadcast %219 : vector<1x25xf32> to vector<8x25xf32>
      %244 = arith.mulf %242, %243 : vector<8x25xf32>
      %cst_20 = arith.constant 100530.969 : f32
      %245 = vector.broadcast %cst_20 : f32 to vector<8x25xf32>
      %246 = arith.mulf %245, %244 : vector<8x25xf32>
      %c12_i32_21 = arith.constant 12 : i32
      %247 = vector.broadcast %c12_i32_21 : i32 to vector<8x25xi32>
      %248 = arith.cmpi eq, %220, %247 : vector<8x25xi32>
      %cst_22 = arith.constant 1.000000e+00 : f32
      %249 = vector.broadcast %cst_22 : f32 to vector<8x25xf32>
      %250 = arith.select %248, %249, %246 : vector<8x25xi1>, vector<8x25xf32>
      %c12_i32_23 = arith.constant 12 : i32
      %251 = vector.broadcast %c12_i32_23 : i32 to vector<8x25xi32>
      %252 = arith.cmpi eq, %220, %251 : vector<8x25xi32>
      %253 = math.sin %250 : vector<8x25xf32>
      %254 = arith.divf %253, %250 : vector<8x25xf32>
      %cst_24 = arith.constant 1.000000e+00 : f32
      %255 = vector.broadcast %cst_24 : f32 to vector<8x25xf32>
      %256 = arith.select %252, %255, %254 : vector<8x25xi1>, vector<8x25xf32>
      %257 = vector.broadcast %241 : vector<8x1xf32> to vector<8x25xf32>
      %258 = arith.mulf %257, %256 : vector<8x25xf32>
      %259 = arith.subf %258, %239 : vector<8x25xf32>
      %cst_25 = arith.constant dense<0xFF800000> : vector<8xf32>
      %260 = vector.multi_reduction <maximumf>, %259, %cst_25 [1] : vector<8x25xf32> to vector<8xf32>
      %261 = vector.shape_cast %260 : vector<8xf32> to vector<8x1xf32>
      %262 = vector.broadcast %261 : vector<8x1xf32> to vector<8x25xf32>
      %263 = arith.divf %259, %262 : vector<8x25xf32>
      %c0_26 = arith.constant 0 : index
      %c0_27 = arith.constant 0 : index
      %264 = vector.load %arg5[%c0_26, %c0_27] : memref<1x25xf32, #tpu.memory_space<vmem>>, vector<1x25xf32>
      %265 = vector.broadcast %264 : vector<1x25xf32> to vector<8x25xf32>
      %266 = arith.mulf %263, %265 : vector<8x25xf32>
      %c0_28 = arith.constant 0 : index
      %c0_29 = arith.constant 0 : index
      %267 = vector.load %arg8[%c0_28, %c0_29] : memref<8x25xf32, #tpu.memory_space<vmem>>, vector<8x25xf32>
      tpu.vector_store %arg8[%c0_28, %c0_29], %266 {strides = array<i32>} : memref<8x25xf32, #tpu.memory_space<vmem>>, vector<8x25xf32>,
    } else {
    }
    %c128_i32 = arith.constant 128 : i32
    %3 = arith.muli %arg1, %c128_i32 : i32
    %4 = tpu.assume_multiple %3, 128 : i32
    %c0 = arith.constant 0 : index
    %5 = arith.index_cast %4 : i32 to index
    %6 = vector.load %arg6[%c0, %5] : memref<2x536xf32, #tpu.memory_space<vmem>>, vector<2x152xf32>
    %c0_1 = arith.constant 0 : index
    %c0_2 = arith.constant 0 : index
    %7 = vector.load %arg8[%c0_1, %c0_2] : memref<8x25xf32, #tpu.memory_space<vmem>>, vector<8x25xf32>
    %cst = arith.constant 0.000000e+00 : f32
    %8 = vector.broadcast %cst : f32 to vector<2x8x128xf32>
    %9 = vector.extract_strided_slice %6 {offsets = [0, 0], sizes = [2, 128], strides = [1, 1]} : vector<2x152xf32> to vector<2x128xf32>
    %10 = vector.extract_strided_slice %7 {offsets = [0, 0], sizes = [8, 1], strides = [1, 1]} : vector<8x25xf32> to vector<8x1xf32>
    %11 = vector.shape_cast %10 : vector<8x1xf32> to vector<1x8x1xf32>
    %12 = vector.shape_cast %9 : vector<2x128xf32> to vector<2x1x128xf32>
    %13 = vector.broadcast %11 : vector<1x8x1xf32> to vector<2x8x128xf32>
    %14 = vector.broadcast %12 : vector<2x1x128xf32> to vector<2x8x128xf32>
    %15 = arith.mulf %13, %14 : vector<2x8x128xf32>
    %16 = arith.addf %8, %15 : vector<2x8x128xf32>
    %17 = vector.extract_strided_slice %6 {offsets = [0, 1], sizes = [2, 128], strides = [1, 1]} : vector<2x152xf32> to vector<2x128xf32>
    %18 = vector.extract_strided_slice %7 {offsets = [0, 1], sizes = [8, 1], strides = [1, 1]} : vector<8x25xf32> to vector<8x1xf32>
    %19 = vector.shape_cast %18 : vector<8x1xf32> to vector<1x8x1xf32>
    %20 = vector.shape_cast %17 : vector<2x128xf32> to vector<2x1x128xf32>
    %21 = vector.broadcast %19 : vector<1x8x1xf32> to vector<2x8x128xf32>
    %22 = vector.broadcast %20 : vector<2x1x128xf32> to vector<2x8x128xf32>
    %23 = arith.mulf %21, %22 : vector<2x8x128xf32>
    %24 = arith.addf %16, %23 : vector<2x8x128xf32>
    %25 = vector.extract_strided_slice %6 {offsets = [0, 2], sizes = [2, 128], strides = [1, 1]} : vector<2x152xf32> to vector<2x128xf32>
    %26 = vector.extract_strided_slice %7 {offsets = [0, 2], sizes = [8, 1], strides = [1, 1]} : vector<8x25xf32> to vector<8x1xf32>
    %27 = vector.shape_cast %26 : vector<8x1xf32> to vector<1x8x1xf32>
    %28 = vector.shape_cast %25 : vector<2x128xf32> to vector<2x1x128xf32>
    %29 = vector.broadcast %27 : vector<1x8x1xf32> to vector<2x8x128xf32>
    %30 = vector.broadcast %28 : vector<2x1x128xf32> to vector<2x8x128xf32>
    %31 = arith.mulf %29, %30 : vector<2x8x128xf32>
    %32 = arith.addf %24, %31 : vector<2x8x128xf32>
    %33 = vector.extract_strided_slice %6 {offsets = [0, 3], sizes = [2, 128], strides = [1, 1]} : vector<2x152xf32> to vector<2x128xf32>
    %34 = vector.extract_strided_slice %7 {offsets = [0, 3], sizes = [8, 1], strides = [1, 1]} : vector<8x25xf32> to vector<8x1xf32>
    %35 = vector.shape_cast %34 : vector<8x1xf32> to vector<1x8x1xf32>
    %36 = vector.shape_cast %33 : vector<2x128xf32> to vector<2x1x128xf32>
    %37 = vector.broadcast %35 : vector<1x8x1xf32> to vector<2x8x128xf32>
    %38 = vector.broadcast %36 : vector<2x1x128xf32> to vector<2x8x128xf32>
    %39 = arith.mulf %37, %38 : vector<2x8x128xf32>
    %40 = arith.addf %32, %39 : vector<2x8x128xf32>
    %41 = vector.extract_strided_slice %6 {offsets = [0, 4], sizes = [2, 128], strides = [1, 1]} : vector<2x152xf32> to vector<2x128xf32>
    %42 = vector.extract_strided_slice %7 {offsets = [0, 4], sizes = [8, 1], strides = [1, 1]} : vector<8x25xf32> to vector<8x1xf32>
    %43 = vector.shape_cast %42 : vector<8x1xf32> to vector<1x8x1xf32>
    %44 = vector.shape_cast %41 : vector<2x128xf32> to vector<2x1x128xf32>
    %45 = vector.broadcast %43 : vector<1x8x1xf32> to vector<2x8x128xf32>
    %46 = vector.broadcast %44 : vector<2x1x128xf32> to vector<2x8x128xf32>
    %47 = arith.mulf %45, %46 : vector<2x8x128xf32>
    %48 = arith.addf %40, %47 : vector<2x8x128xf32>
    %49 = vector.extract_strided_slice %6 {offsets = [0, 5], sizes = [2, 128], strides = [1, 1]} : vector<2x152xf32> to vector<2x128xf32>
    %50 = vector.extract_strided_slice %7 {offsets = [0, 5], sizes = [8, 1], strides = [1, 1]} : vector<8x25xf32> to vector<8x1xf32>
    %51 = vector.shape_cast %50 : vector<8x1xf32> to vector<1x8x1xf32>
    %52 = vector.shape_cast %49 : vector<2x128xf32> to vector<2x1x128xf32>
    %53 = vector.broadcast %51 : vector<1x8x1xf32> to vector<2x8x128xf32>
    %54 = vector.broadcast %52 : vector<2x1x128xf32> to vector<2x8x128xf32>
    %55 = arith.mulf %53, %54 : vector<2x8x128xf32>
    %56 = arith.addf %48, %55 : vector<2x8x128xf32>
    %57 = vector.extract_strided_slice %6 {offsets = [0, 6], sizes = [2, 128], strides = [1, 1]} : vector<2x152xf32> to vector<2x128xf32>
    %58 = vector.extract_strided_slice %7 {offsets = [0, 6], sizes = [8, 1], strides = [1, 1]} : vector<8x25xf32> to vector<8x1xf32>
    %59 = vector.shape_cast %58 : vector<8x1xf32> to vector<1x8x1xf32>
    %60 = vector.shape_cast %57 : vector<2x128xf32> to vector<2x1x128xf32>
    %61 = vector.broadcast %59 : vector<1x8x1xf32> to vector<2x8x128xf32>
    %62 = vector.broadcast %60 : vector<2x1x128xf32> to vector<2x8x128xf32>
    %63 = arith.mulf %61, %62 : vector<2x8x128xf32>
    %64 = arith.addf %56, %63 : vector<2x8x128xf32>
    %65 = vector.extract_strided_slice %6 {offsets = [0, 7], sizes = [2, 128], strides = [1, 1]} : vector<2x152xf32> to vector<2x128xf32>
    %66 = vector.extract_strided_slice %7 {offsets = [0, 7], sizes = [8, 1], strides = [1, 1]} : vector<8x25xf32> to vector<8x1xf32>
    %67 = vector.shape_cast %66 : vector<8x1xf32> to vector<1x8x1xf32>
    %68 = vector.shape_cast %65 : vector<2x128xf32> to vector<2x1x128xf32>
    %69 = vector.broadcast %67 : vector<1x8x1xf32> to vector<2x8x128xf32>
    %70 = vector.broadcast %68 : vector<2x1x128xf32> to vector<2x8x128xf32>
    %71 = arith.mulf %69, %70 : vector<2x8x128xf32>
    %72 = arith.addf %64, %71 : vector<2x8x128xf32>
    %73 = vector.extract_strided_slice %6 {offsets = [0, 8], sizes = [2, 128], strides = [1, 1]} : vector<2x152xf32> to vector<2x128xf32>
    %74 = vector.extract_strided_slice %7 {offsets = [0, 8], sizes = [8, 1], strides = [1, 1]} : vector<8x25xf32> to vector<8x1xf32>
    %75 = vector.shape_cast %74 : vector<8x1xf32> to vector<1x8x1xf32>
    %76 = vector.shape_cast %73 : vector<2x128xf32> to vector<2x1x128xf32>
    %77 = vector.broadcast %75 : vector<1x8x1xf32> to vector<2x8x128xf32>
    %78 = vector.broadcast %76 : vector<2x1x128xf32> to vector<2x8x128xf32>
    %79 = arith.mulf %77, %78 : vector<2x8x128xf32>
    %80 = arith.addf %72, %79 : vector<2x8x128xf32>
    %81 = vector.extract_strided_slice %6 {offsets = [0, 9], sizes = [2, 128], strides = [1, 1]} : vector<2x152xf32> to vector<2x128xf32>
    %82 = vector.extract_strided_slice %7 {offsets = [0, 9], sizes = [8, 1], strides = [1, 1]} : vector<8x25xf32> to vector<8x1xf32>
    %83 = vector.shape_cast %82 : vector<8x1xf32> to vector<1x8x1xf32>
    %84 = vector.shape_cast %81 : vector<2x128xf32> to vector<2x1x128xf32>
    %85 = vector.broadcast %83 : vector<1x8x1xf32> to vector<2x8x128xf32>
    %86 = vector.broadcast %84 : vector<2x1x128xf32> to vector<2x8x128xf32>
    %87 = arith.mulf %85, %86 : vector<2x8x128xf32>
    %88 = arith.addf %80, %87 : vector<2x8x128xf32>
    %89 = vector.extract_strided_slice %6 {offsets = [0, 10], sizes = [2, 128], strides = [1, 1]} : vector<2x152xf32> to vector<2x128xf32>
    %90 = vector.extract_strided_slice %7 {offsets = [0, 10], sizes = [8, 1], strides = [1, 1]} : vector<8x25xf32> to vector<8x1xf32>
    %91 = vector.shape_cast %90 : vector<8x1xf32> to vector<1x8x1xf32>
    %92 = vector.shape_cast %89 : vector<2x128xf32> to vector<2x1x128xf32>
    %93 = vector.broadcast %91 : vector<1x8x1xf32> to vector<2x8x128xf32>
    %94 = vector.broadcast %92 : vector<2x1x128xf32> to vector<2x8x128xf32>
    %95 = arith.mulf %93, %94 : vector<2x8x128xf32>
    %96 = arith.addf %88, %95 : vector<2x8x128xf32>
    %97 = vector.extract_strided_slice %6 {offsets = [0, 11], sizes = [2, 128], strides = [1, 1]} : vector<2x152xf32> to vector<2x128xf32>
    %98 = vector.extract_strided_slice %7 {offsets = [0, 11], sizes = [8, 1], strides = [1, 1]} : vector<8x25xf32> to vector<8x1xf32>
    %99 = vector.shape_cast %98 : vector<8x1xf32> to vector<1x8x1xf32>
    %100 = vector.shape_cast %97 : vector<2x128xf32> to vector<2x1x128xf32>
    %101 = vector.broadcast %99 : vector<1x8x1xf32> to vector<2x8x128xf32>
    %102 = vector.broadcast %100 : vector<2x1x128xf32> to vector<2x8x128xf32>
    %103 = arith.mulf %101, %102 : vector<2x8x128xf32>
    %104 = arith.addf %96, %103 : vector<2x8x128xf32>
    %105 = vector.extract_strided_slice %6 {offsets = [0, 12], sizes = [2, 128], strides = [1, 1]} : vector<2x152xf32> to vector<2x128xf32>
    %106 = vector.extract_strided_slice %7 {offsets = [0, 12], sizes = [8, 1], strides = [1, 1]} : vector<8x25xf32> to vector<8x1xf32>
    %107 = vector.shape_cast %106 : vector<8x1xf32> to vector<1x8x1xf32>
    %108 = vector.shape_cast %105 : vector<2x128xf32> to vector<2x1x128xf32>
    %109 = vector.broadcast %107 : vector<1x8x1xf32> to vector<2x8x128xf32>
    %110 = vector.broadcast %108 : vector<2x1x128xf32> to vector<2x8x128xf32>
    %111 = arith.mulf %109, %110 : vector<2x8x128xf32>
    %112 = arith.addf %104, %111 : vector<2x8x128xf32>
    %113 = vector.extract_strided_slice %6 {offsets = [0, 13], sizes = [2, 128], strides = [1, 1]} : vector<2x152xf32> to vector<2x128xf32>
    %114 = vector.extract_strided_slice %7 {offsets = [0, 13], sizes = [8, 1], strides = [1, 1]} : vector<8x25xf32> to vector<8x1xf32>
    %115 = vector.shape_cast %114 : vector<8x1xf32> to vector<1x8x1xf32>
    %116 = vector.shape_cast %113 : vector<2x128xf32> to vector<2x1x128xf32>
    %117 = vector.broadcast %115 : vector<1x8x1xf32> to vector<2x8x128xf32>
    %118 = vector.broadcast %116 : vector<2x1x128xf32> to vector<2x8x128xf32>
    %119 = arith.mulf %117, %118 : vector<2x8x128xf32>
    %120 = arith.addf %112, %119 : vector<2x8x128xf32>
    %121 = vector.extract_strided_slice %6 {offsets = [0, 14], sizes = [2, 128], strides = [1, 1]} : vector<2x152xf32> to vector<2x128xf32>
    %122 = vector.extract_strided_slice %7 {offsets = [0, 14], sizes = [8, 1], strides = [1, 1]} : vector<8x25xf32> to vector<8x1xf32>
    %123 = vector.shape_cast %122 : vector<8x1xf32> to vector<1x8x1xf32>
    %124 = vector.shape_cast %121 : vector<2x128xf32> to vector<2x1x128xf32>
    %125 = vector.broadcast %123 : vector<1x8x1xf32> to vector<2x8x128xf32>
    %126 = vector.broadcast %124 : vector<2x1x128xf32> to vector<2x8x128xf32>
    %127 = arith.mulf %125, %126 : vector<2x8x128xf32>
    %128 = arith.addf %120, %127 : vector<2x8x128xf32>
    %129 = vector.extract_strided_slice %6 {offsets = [0, 15], sizes = [2, 128], strides = [1, 1]} : vector<2x152xf32> to vector<2x128xf32>
    %130 = vector.extract_strided_slice %7 {offsets = [0, 15], sizes = [8, 1], strides = [1, 1]} : vector<8x25xf32> to vector<8x1xf32>
    %131 = vector.shape_cast %130 : vector<8x1xf32> to vector<1x8x1xf32>
    %132 = vector.shape_cast %129 : vector<2x128xf32> to vector<2x1x128xf32>
    %133 = vector.broadcast %131 : vector<1x8x1xf32> to vector<2x8x128xf32>
    %134 = vector.broadcast %132 : vector<2x1x128xf32> to vector<2x8x128xf32>
    %135 = arith.mulf %133, %134 : vector<2x8x128xf32>
    %136 = arith.addf %128, %135 : vector<2x8x128xf32>
    %137 = vector.extract_strided_slice %6 {offsets = [0, 16], sizes = [2, 128], strides = [1, 1]} : vector<2x152xf32> to vector<2x128xf32>
    %138 = vector.extract_strided_slice %7 {offsets = [0, 16], sizes = [8, 1], strides = [1, 1]} : vector<8x25xf32> to vector<8x1xf32>
    %139 = vector.shape_cast %138 : vector<8x1xf32> to vector<1x8x1xf32>
    %140 = vector.shape_cast %137 : vector<2x128xf32> to vector<2x1x128xf32>
    %141 = vector.broadcast %139 : vector<1x8x1xf32> to vector<2x8x128xf32>
    %142 = vector.broadcast %140 : vector<2x1x128xf32> to vector<2x8x128xf32>
    %143 = arith.mulf %141, %142 : vector<2x8x128xf32>
    %144 = arith.addf %136, %143 : vector<2x8x128xf32>
    %145 = vector.extract_strided_slice %6 {offsets = [0, 17], sizes = [2, 128], strides = [1, 1]} : vector<2x152xf32> to vector<2x128xf32>
    %146 = vector.extract_strided_slice %7 {offsets = [0, 17], sizes = [8, 1], strides = [1, 1]} : vector<8x25xf32> to vector<8x1xf32>
    %147 = vector.shape_cast %146 : vector<8x1xf32> to vector<1x8x1xf32>
    %148 = vector.shape_cast %145 : vector<2x128xf32> to vector<2x1x128xf32>
    %149 = vector.broadcast %147 : vector<1x8x1xf32> to vector<2x8x128xf32>
    %150 = vector.broadcast %148 : vector<2x1x128xf32> to vector<2x8x128xf32>
    %151 = arith.mulf %149, %150 : vector<2x8x128xf32>
    %152 = arith.addf %144, %151 : vector<2x8x128xf32>
    %153 = vector.extract_strided_slice %6 {offsets = [0, 18], sizes = [2, 128], strides = [1, 1]} : vector<2x152xf32> to vector<2x128xf32>
    %154 = vector.extract_strided_slice %7 {offsets = [0, 18], sizes = [8, 1], strides = [1, 1]} : vector<8x25xf32> to vector<8x1xf32>
    %155 = vector.shape_cast %154 : vector<8x1xf32> to vector<1x8x1xf32>
    %156 = vector.shape_cast %153 : vector<2x128xf32> to vector<2x1x128xf32>
    %157 = vector.broadcast %155 : vector<1x8x1xf32> to vector<2x8x128xf32>
    %158 = vector.broadcast %156 : vector<2x1x128xf32> to vector<2x8x128xf32>
    %159 = arith.mulf %157, %158 : vector<2x8x128xf32>
    %160 = arith.addf %152, %159 : vector<2x8x128xf32>
    %161 = vector.extract_strided_slice %6 {offsets = [0, 19], sizes = [2, 128], strides = [1, 1]} : vector<2x152xf32> to vector<2x128xf32>
    %162 = vector.extract_strided_slice %7 {offsets = [0, 19], sizes = [8, 1], strides = [1, 1]} : vector<8x25xf32> to vector<8x1xf32>
    %163 = vector.shape_cast %162 : vector<8x1xf32> to vector<1x8x1xf32>
    %164 = vector.shape_cast %161 : vector<2x128xf32> to vector<2x1x128xf32>
    %165 = vector.broadcast %163 : vector<1x8x1xf32> to vector<2x8x128xf32>
    %166 = vector.broadcast %164 : vector<2x1x128xf32> to vector<2x8x128xf32>
    %167 = arith.mulf %165, %166 : vector<2x8x128xf32>
    %168 = arith.addf %160, %167 : vector<2x8x128xf32>
    %169 = vector.extract_strided_slice %6 {offsets = [0, 20], sizes = [2, 128], strides = [1, 1]} : vector<2x152xf32> to vector<2x128xf32>
    %170 = vector.extract_strided_slice %7 {offsets = [0, 20], sizes = [8, 1], strides = [1, 1]} : vector<8x25xf32> to vector<8x1xf32>
    %171 = vector.shape_cast %170 : vector<8x1xf32> to vector<1x8x1xf32>
    %172 = vector.shape_cast %169 : vector<2x128xf32> to vector<2x1x128xf32>
    %173 = vector.broadcast %171 : vector<1x8x1xf32> to vector<2x8x128xf32>
    %174 = vector.broadcast %172 : vector<2x1x128xf32> to vector<2x8x128xf32>
    %175 = arith.mulf %173, %174 : vector<2x8x128xf32>
    %176 = arith.addf %168, %175 : vector<2x8x128xf32>
    %177 = vector.extract_strided_slice %6 {offsets = [0, 21], sizes = [2, 128], strides = [1, 1]} : vector<2x152xf32> to vector<2x128xf32>
    %178 = vector.extract_strided_slice %7 {offsets = [0, 21], sizes = [8, 1], strides = [1, 1]} : vector<8x25xf32> to vector<8x1xf32>
    %179 = vector.shape_cast %178 : vector<8x1xf32> to vector<1x8x1xf32>
    %180 = vector.shape_cast %177 : vector<2x128xf32> to vector<2x1x128xf32>
    %181 = vector.broadcast %179 : vector<1x8x1xf32> to vector<2x8x128xf32>
    %182 = vector.broadcast %180 : vector<2x1x128xf32> to vector<2x8x128xf32>
    %183 = arith.mulf %181, %182 : vector<2x8x128xf32>
    %184 = arith.addf %176, %183 : vector<2x8x128xf32>
    %185 = vector.extract_strided_slice %6 {offsets = [0, 22], sizes = [2, 128], strides = [1, 1]} : vector<2x152xf32> to vector<2x128xf32>
    %186 = vector.extract_strided_slice %7 {offsets = [0, 22], sizes = [8, 1], strides = [1, 1]} : vector<8x25xf32> to vector<8x1xf32>
    %187 = vector.shape_cast %186 : vector<8x1xf32> to vector<1x8x1xf32>
    %188 = vector.shape_cast %185 : vector<2x128xf32> to vector<2x1x128xf32>
    %189 = vector.broadcast %187 : vector<1x8x1xf32> to vector<2x8x128xf32>
    %190 = vector.broadcast %188 : vector<2x1x128xf32> to vector<2x8x128xf32>
    %191 = arith.mulf %189, %190 : vector<2x8x128xf32>
    %192 = arith.addf %184, %191 : vector<2x8x128xf32>
    %193 = vector.extract_strided_slice %6 {offsets = [0, 23], sizes = [2, 128], strides = [1, 1]} : vector<2x152xf32> to vector<2x128xf32>
    %194 = vector.extract_strided_slice %7 {offsets = [0, 23], sizes = [8, 1], strides = [1, 1]} : vector<8x25xf32> to vector<8x1xf32>
    %195 = vector.shape_cast %194 : vector<8x1xf32> to vector<1x8x1xf32>
    %196 = vector.shape_cast %193 : vector<2x128xf32> to vector<2x1x128xf32>
    %197 = vector.broadcast %195 : vector<1x8x1xf32> to vector<2x8x128xf32>
    %198 = vector.broadcast %196 : vector<2x1x128xf32> to vector<2x8x128xf32>
    %199 = arith.mulf %197, %198 : vector<2x8x128xf32>
    %200 = arith.addf %192, %199 : vector<2x8x128xf32>
    %201 = vector.extract_strided_slice %6 {offsets = [0, 24], sizes = [2, 128], strides = [1, 1]} : vector<2x152xf32> to vector<2x128xf32>
    %202 = vector.extract_strided_slice %7 {offsets = [0, 24], sizes = [8, 1], strides = [1, 1]} : vector<8x25xf32> to vector<8x1xf32>
    %203 = vector.shape_cast %202 : vector<8x1xf32> to vector<1x8x1xf32>
    %204 = vector.shape_cast %201 : vector<2x128xf32> to vector<2x1x128xf32>
    %205 = vector.broadcast %203 : vector<1x8x1xf32> to vector<2x8x128xf32>
    %206 = vector.broadcast %204 : vector<2x1x128xf32> to vector<2x8x128xf32>
    %207 = arith.mulf %205, %206 : vector<2x8x128xf32>
    %208 = arith.addf %200, %207 : vector<2x8x128xf32>
    %c0_3 = arith.constant 0 : index
    %c0_4 = arith.constant 0 : index
    %c0_5 = arith.constant 0 : index
    %209 = vector.load %arg7[%c0_3, %c0_4, %c0_5] : memref<2x8x128xf32, #tpu.memory_space<vmem>>, vector<2x8x128xf32>
    tpu.vector_store %arg7[%c0_3, %c0_4, %c0_5], %208 {strides = array<i32>} : memref<2x8x128xf32, #tpu.memory_space<vmem>>, vector<2x8x128xf32>,
    return
  }
  func.func @transform_0(%arg0: i32, %arg1: i32) -> (i32, i32) {
    %c0_i32 = arith.constant 0 : i32
    %c0_i32_0 = arith.constant 0 : i32
    %c0_i32_1 = arith.constant 0 : i32
    return %c0_i32, %c0_i32_0 : i32, i32
  }
  func.func @transform_1(%arg0: i32, %arg1: i32) -> (i32, i32) {
    %c0_i32 = arith.constant 0 : i32
    %c0_i32_0 = arith.constant 0 : i32
    %c0_i32_1 = arith.constant 0 : i32
    return %c0_i32, %c0_i32_0 : i32, i32
  }
  func.func @transform_2(%arg0: i32, %arg1: i32) -> (i32, i32) {
    %c0_i32 = arith.constant 0 : i32
    %c0_i32_0 = arith.constant 0 : i32
    %c0_i32_1 = arith.constant 0 : i32
    return %c0_i32, %c0_i32_0 : i32, i32
  }
  func.func @transform_3(%arg0: i32, %arg1: i32) -> (i32, i32) {
    %c0_i32 = arith.constant 0 : i32
    %c0_i32_0 = arith.constant 0 : i32
    %c0_i32_1 = arith.constant 0 : i32
    return %c0_i32, %c0_i32_0 : i32, i32
  }
  func.func @transform_4(%arg0: i32, %arg1: i32) -> (i32, i32) {
    %c0_i32 = arith.constant 0 : i32
    %c0_i32_0 = arith.constant 0 : i32
    return %arg0, %c0_i32 : i32, i32
  }
  func.func @transform_5(%arg0: i32, %arg1: i32) -> (i32, i32, i32) {
    %c0_i32 = arith.constant 0 : i32
    %c0_i32_0 = arith.constant 0 : i32
    return %arg0, %c0_i32, %arg1 : i32, i32, i32
  }
}

</mosaic_0001>

<bundles_post_ra>
// kernel: tpu_custom_call.1
= control target key start
LH: loop header
LB: loop body
LE: loop exit
PB: predicated region body
PF: predicated region fallthrough
CT: control target
= control target key end

     0   :  { %10 = vsyncpa [#allocation4], 0  ;;  %s2263_s0 = inlined_call_operand.vmem [shape: f32[8,1], index: 0, kind: input, shape index: {}]   ;;  %s2264_s1 = inlined_call_operand.vmem [shape: f32[8,1], index: 1, kind: input, shape index: {}]   ;;  %s2265_s2 = inlined_call_operand.vmem [shape: f32[1,25], index: 2, kind: input, shape index: {}]   ;;  %s2266_s3 = inlined_call_operand.vmem [shape: f32[1,25], index: 3, kind: input, shape index: {}]   ;;  %s2267_s4 = inlined_call_operand.vmem [shape: f32[2,536], index: 4, kind: input, shape index: {}]   ;;  %s2268_s5 = inlined_call_operand.hbm [shape: f32[2,8,512], index: 5, kind: output, shape index: {}]  }
   0x1   :  { %12 = vsyncpa [#allocation4 + $0x1], 0  ;;  %s1778_s18 = smov 0   ;;  %s1780_s19 = smov 0  }
   0x2   :  { %s1782_s20 = smov 0   ;;  %s1784_s21 = smov 0  }
   0x3   :  { %s1786_s22 = smov 0   ;;  %s1788_s23 = smov 0  }
   0x4 LB: > { %s1440_s24 = sadd.s32 4294967295, %s1687_s23   ;;  %s1441_s25 = sadd.s32 4294967294, %s1687_s23   ;;  %s1687_s23 = sphi %s1788_s23, %s18_s23   ;;  %s1683_s22 = sphi %s1786_s22, %s2277_s22   ;;  %s1679_s21 = sphi %s1784_s21, %s2276_s21   ;;  %s1675_s20 = sphi %s1782_s20, %s2275_s20   ;;  %s1671_s19 = sphi %s1780_s19, %s2274_s19   ;;  %s1667_s18 = sphi %s1778_s18, %s2273_s18  }
   0x5   : > { %s27_s26 = sadd.s32 1, %s1683_s22  ;;  %s149_s27 = sadd.s32 1, %s1675_s20 }
   0x6   : > { %p28_p0 = scmp.ge.s32.totalorder %s27_s26, 4  ;;  %p159_p1 = scmp.ne.s32.totalorder %s1675_s20, %s1671_s19 }
   0x7   : > { %p160_p2 = scmp.eq.s32.totalorder %s1440_s24, 3  ;;  %p165_p3 = scmp.ne.s32.totalorder %s1671_s19, %s1667_s18 }
   0x8   : > { %s2279_s26 = smov (%p28_p0, %s27_s26), 0  ;;  %p166_p5 = scmp.eq.s32.totalorder %s1441_s25, 3 }
   0x9   : > { %p1818_p4 = por %p160_p2, %p159_p1  ;;  %s145_s29 = ssub.s32 %s1683_s22, %s2279_s26 }
   0xa   : > { %p1444_p6 = scmp.ge.s32.totalorder %s1687_s23, 1  ;;  %p147_p7 = scmp.eq.s32.totalorder %s145_s29, 0 }
   0xb   : > { %p1825_p8 = por %p166_p5, %p165_p3  ;;  %p204_p9 = scmp.lt.s32.totalorder %s1687_s23, 5 }
   0xc   : > { %s1831_s6 = scalar_select %p147_p7, %s1675_s20, %s149_s27  }
   0xd   : > { %p205_p10 = pnand %p1444_p6, %p204_p9 }
   0xe   : > { %s229_s7 = sand.u32 (!%p205_p10), 1, %s1671_s19   ;;  %p1446_p11 = scmp.ne.s32.totalorder (!%p205_p10), %s1679_s21, 0 }
   0xf   : > { %208 = sbr.rel (%p205_p10) target bundleno = 1134 (0x46e), region = 40  ;;  %s1445_s8 = sshll.u32 (!%p205_p10), %s229_s7, 4 }
  0x10   : > { %s1836_s9 = scalar_lea.vmem (!%p205_p10), [#allocation3], %s1445_s8 }
  0x14   : > { %241 = sbr.rel (%p1446_p11) target bundleno = 412 (0x19c), region = 44 }
  0x19   : > { %v242_v0 = vld [vmem:[%s2263_s0] sm:$0xff]  ;;  %v1689_v1 = vmov 0   ;;  %v250_v10 = vlaneseq  ;;  %v1690_v37 = vmov 683565275   ;;  %v1691_v39 = vmov 2475754826  }
  0x1a   : > { %1573 = vset.pattern.permute.xlu0 %v1689_v1  ;;  %v243_v2 = vand.u32 2147483647, %v242_v0  ;;  %1574 = vset.pattern.permute.xlu1 %v1689_v1  ;;  %v246_v3 = vld [vmem:[%s2264_s1] sm:$0xff]  ;;  %v1692_v41 = vmov 2131351028  }
  0x1b   : > { %v247_v6 = vand.u32 2147483647, %v246_v3  ;;  %v1575_v11 = vld [vmem:[%s2265_s2] ss:$0 sm:$0xff]  ;;  %v1850_v12 = vand.u32 127, %v250_v10 }
  0x1c   : > { %v244_v4 = vadd.f32 0.003125, %v243_v2  ;;  %v1693_v46 = vmov 2102212464   ;;  %v1694_v49 = vmov 920167782  }
  0x1d   : > { %vm263_vm0 = vcmp.eq.s32.totalorder %v1850_v12, 12  ;;  %v1695_v52 = vmov 1326507024  }
  0x1e   : > { %255 = vperm.xlu0 %1573, %v244_v4   ;;  %v245_v5 = vadd.f32 0.003125, %v244_v4  ;;  %v252_v7 = vmul.f32 2.0, %v244_v4 }
  0x20   : > { %438 = vperm.xlu1 %1574, %v252_v7   ;;  %v248_v8 = vadd.f32 %v247_v6, %v245_v5 }
  0x22   : > { %v442_v9 = vmul.f32 2.0, %v248_v8 }
  0x26   : > { %445 = vperm.xlu0 %1573, %v248_v8  }
  0x28   : > { %624 = vperm.xlu1 %1574, %v442_v9  }
  0x90   : > { %v256_v13 = vpop.permute.xlu0 %255 }
  0x91   : > { %v261_v14 = vmul.f32 %v1575_v11, %v256_v13 }
  0x93   : > { %v262_v15 = vmul.f32 100530.97, %v261_v14 }
  0x95   : > { %v1855_v16 = vsel %vm263_vm0, 1.0, %v262_v15 }
  0x96   : > { %v268_v17 = vand.u32 2139095040, %v1855_v16  ;;  %v1859_v18 = vand.u32 2147483647, %v1855_v16  ;;  %1577 = vrcp.f32 %v1855_v16 }
  0x98   : > { %v269_v19 = vshrl.u32 %v268_v17, 23  ;;  %v446_v20 = vpop.permute.xlu0 %445  ;;  %v272_v21 = vand.u32 8388607, %v1859_v18 }
  0x99   : > { %v448_v22 = vmul.f32 %v1575_v11, %v446_v20 }
  0x9a   : > { %v1447_v23 = vadd.s32 4294967169, %v269_v19  ;;  %v273_v24 = vor.u32 8388608, %v272_v21 }
  0x9b   : > { %v449_v25 = vmul.f32 100530.97, %v448_v22 }
  0x9c   : > { %v275_v26 = vadd.s32 1, %v1447_v23  ;;  %v1867_v29 = vshll.u32 %v273_v24, 8 }
  0x9d   : > { %v1864_v27 = vsel %vm263_vm0, 1.0, %v449_v25 }
  0x9e   : > { %vm276_vm1 = vcmp.gt.s32.totalorder %v275_v26, 0  ;;  %v454_v28 = vand.u32 2139095040, %v1864_v27  ;;  %v314_v35 = vand.u32 65535, %v1867_v29  ;;  %v315_v56 = vshrl.u32 %v1867_v29, 16 }
  0x9f   : > { %v277_v30 = vsel %vm276_vm1, %v275_v26, 0  ;;  %v1883_v5 = vand.u32 2147483647, %v1864_v27  ;;  %1579 = vrcp.f32 %v1864_v27 }
  0xa0   : > { %v279_v31 = vand.u32 31, %v277_v30  ;;  %v455_v32 = vshrl.u32 %v454_v28, 23  ;;  %v278_v36 = vshrl.u32 %v277_v30, 5 }
  0xa1   : > { %v458_v22 = vand.u32 8388607, %v1883_v5 }
  0xa2   : > { %v280_v33 = vsub.s32 32, %v279_v31  ;;  %v1450_v34 = vadd.s32 4294967169, %v455_v32  ;;  %v282_v38 = vshll.u32 %v1690_v37, %v279_v31  ;;  %v285_v40 = vshll.u32 %v1691_v39, %v279_v31 }
  0xa3   : > { %v288_v42 = vshll.u32 %v1692_v41, %v279_v31  ;;  %v291_v47 = vshll.u32 %v1693_v46, %v279_v31  ;;  %v294_v51 = vshll.u32 %v1694_v49, %v279_v31  ;;  %vm297_vm3 = vcmp.lt.s32.totalorder %v278_v36, 1 }
  0xa4   : > { %v461_v43 = vadd.s32 1, %v1450_v34  ;;  %v283_v44 = vshrl.u32 %v1691_v39, %v280_v33  ;;  %v286_v45 = vshrl.u32 %v1692_v41, %v280_v33  ;;  %v289_v48 = vshrl.u32 %v1693_v46, %v280_v33 }
  0xa5   : > { %v292_v50 = vshrl.u32 %v1694_v49, %v280_v33  ;;  %v295_v53 = vshrl.u32 %v1695_v52, %v280_v33  ;;  %v281_v61 = vshrl.u32 %v1690_v37, %v280_v33  ;;  %vm299_vm4 = vcmp.lt.s32.totalorder %v278_v36, 3 }
  0xa6   : > { %vm462_vm2 = vcmp.gt.s32.totalorder %v461_v43, 0  ;;  %v284_v54 = vor.u32 %v283_v44, %v282_v38  ;;  %v287_v55 = vor.u32 %v286_v45, %v285_v40  ;;  %v290_v57 = vor.u32 %v289_v48, %v288_v42 }
  0xa7   : > { %v293_v58 = vor.u32 %v292_v50, %v291_v47  ;;  %v296_v59 = vor.u32 %v295_v53, %v294_v51  ;;  %v463_v60 = vsel %vm462_vm2, %v461_v43, 0  ;;  %vm300_vm5 = vcmp.lt.s32.totalorder %v278_v36, 4 }
  0xa8   : > { %v302_v62 = vsel %vm300_vm5, %v290_v57, 2102212464  ;;  %v305_v63 = vsel %vm297_vm3, %v284_v54, %v287_v55  ;;  %v309_v2 = vsel %vm297_vm3, %v287_v55, %v290_v57  ;;  %vm298_vm6 = vcmp.lt.s32.totalorder %v278_v36, 2 }
  0xa9   : > { %v306_v0 = vsel %vm300_vm5, %v293_v58, 920167782  ;;  %v310_v4 = vsel %vm300_vm5, %v296_v59, 1326507024  ;;  %v465_v6 = vand.u32 31, %v463_v60  ;;  %v301_v7 = vsel %vm297_vm3, %v281_v61, %v284_v54 }
  0xaa   : > { %v307_v3 = vsel %vm299_vm4, %v290_v57, %v306_v0  ;;  %v311_v9 = vsel %vm299_vm4, %v293_v58, %v310_v4  ;;  %v303_v10 = vsel %vm299_vm4, %v287_v55, %v302_v62  ;;  %v1887_v19 = vshrl.u32 %v463_v60, 5 }
  0xab   : > { %v308_v8 = vsel %vm298_vm6, %v305_v63, %v307_v3  ;;  %v312_v11 = vsel %vm298_vm6, %v309_v2, %v311_v9  ;;  %v1890_v23 = vsub.s32 32, %v465_v6  ;;  %v1893_v24 = vsel %vm298_vm6, %v301_v7, %v303_v10 }
  0xac   : > { %v338_v13 = vand.u32 65535, %v308_v8  ;;  %v339_v14 = vshrl.u32 %v308_v8, 16  ;;  %v316_v15 = vand.u32 65535, %v312_v11  ;;  %v317_v17 = vshrl.u32 %v312_v11, 16 }
  0xad   : > { %v469_v54 = vshrl.u32 %v1691_v39, %v1890_v23  ;;  %v471_v57 = vshll.u32 %v1691_v39, %v465_v6  ;;  %v472_v58 = vshrl.u32 %v1692_v41, %v1890_v23  ;;  %v474_v61 = vshll.u32 %v1692_v41, %v465_v6 }
  0xae   : > { %v341_v20 = vmul.u32 %v339_v14, %v314_v35  ;;  %v342_v21 = vmul.u32 %v338_v13, %v315_v56  ;;  %v319_v25 = vmul.u32 %v317_v17, %v314_v35  ;;  %v320_v26 = vmul.u32 %v316_v15, %v315_v56 }
  0xaf   : > { %v318_v28 = vmul.u32 %v316_v15, %v314_v35  ;;  %v340_v30 = vmul.u32 %v338_v13, %v314_v35  ;;  %v343_v31 = vmul.u32 %v339_v14, %v315_v56  ;;  %v321_v33 = vmul.u32 %v317_v17, %v315_v56 }
  0xb0   : > { %v344_v32 = vshll.u32 %v341_v20, 16  ;;  %v322_v34 = vshll.u32 %v319_v25, 16  ;;  %v345_v38 = vshrl.u32 %v341_v20, 16  ;;  %v346_v40 = vshll.u32 %v342_v21, 16 }
  0xb1   : > { %v323_v42 = vshrl.u32 %v319_v25, 16  ;;  %v347_v43 = vshrl.u32 %v342_v21, 16  ;;  %v324_v45 = vshll.u32 %v320_v26, 16  ;;  %v468_v35 = vshll.u32 %v1690_v37, %v465_v6 }
  0xb2   : > { %vm348_vm7 = vc.u32 %v340_v30, %v344_v32  ;;  %v350_v44 = vadd.s32 %v344_v32, %v340_v30  ;;  %vm326_vm8 = vc.u32 %v318_v28, %v322_v34  ;;  %v328_v47 = vadd.s32 %v322_v34, %v318_v28 }
  0xb3   : > { %v349_v36 = vsel %vm348_vm7, 1, %v1689_v1  ;;  %v327_v48 = vsel %vm326_vm8, 1, %v1689_v1  ;;  %v1905_v60 = vor.u32 %v469_v54, %v468_v35  ;;  %v475_v62 = vshrl.u32 %v1693_v46, %v1890_v23 }
  0xb4   : > { %v351_v50 = vadd.s32 %v349_v36, %v343_v31  ;;  %vm352_vm9 = vc.u32 %v350_v44, %v346_v40  ;;  %v329_v51 = vadd.s32 %v327_v48, %v321_v33  ;;  %vm330_vm10 = vc.u32 %v328_v47, %v324_v45 }
  0xb5   : > { %v353_v53 = vsel %vm352_vm9, 1, %v1689_v1  ;;  %v331_v55 = vsel %vm330_vm10, 1, %v1689_v1  ;;  %v1910_v0 = vor.u32 %v472_v58, %v471_v57  ;;  %v477_v2 = vshll.u32 %v1693_v46, %v465_v6 }
  0xb6   : > { %v355_v56 = vadd.s32 %v353_v53, %v351_v50  ;;  %v333_v59 = vadd.s32 %v331_v55, %v329_v51  ;;  %v478_v3 = vshrl.u32 %v1694_v49, %v1890_v23  ;;  %v325_v39 = vshrl.u32 %v320_v26, 16 }
  0xb7   : > { %v480_v7 = vshll.u32 %v1694_v49, %v465_v6  ;;  %v481_v8 = vshrl.u32 %v1695_v52, %v1890_v23  ;;  %v459_v41 = vor.u32 8388608, %v458_v22  ;;  %v476_v10 = vor.u32 %v475_v62, %v474_v61 }
  0xb8   : > { %v356_v63 = vadd.s32 %v355_v56, %v345_v38  ;;  %v334_v4 = vadd.s32 %v333_v59, %v323_v42  ;;  %v479_v11 = vor.u32 %v478_v3, %v477_v2  ;;  %v1920_v14 = vadd.s32 %v350_v44, %v346_v40 }
  0xb9   : > { %v482_v15 = vor.u32 %v481_v8, %v480_v7  ;;  %vm483_vm11 = vcmp.lt.s32.totalorder %v1887_v19, 1  ;;  %vm486_vm12 = vcmp.lt.s32.totalorder %v1887_v19, 4  ;;  %v358_v52 = vmul.u32 %v1867_v29, %v1893_v24 }
  0xba   : > { %v357_v9 = vadd.s32 %v356_v63, %v347_v43  ;;  %v1918_v13 = vadd.s32 %v334_v4, %v325_v39  ;;  %v491_v49 = vsel %vm483_vm11, %v1905_v60, %v1910_v0  ;;  %vm485_vm14 = vcmp.lt.s32.totalorder %v1887_v19, 3 }
  0xbb   : > { %v492_v6 = vsel %vm486_vm12, %v479_v11, 920167782  ;;  %vm484_vm15 = vcmp.lt.s32.totalorder %v1887_v19, 2  ;;  %v495_v21 = vsel %vm483_vm11, %v1910_v0, %v476_v10  ;;  %v496_v24 = vsel %vm486_vm12, %v482_v15, 1326507024 }
  0xbc   : > { %v361_v46 = vadd.s32 1, %v357_v9  ;;  %vm360_vm13 = vc.u32 %v1918_v13, %v1920_v14  ;;  %v493_v20 = vsel %vm485_vm14, %v476_v10, %v492_v6  ;;  %v1945_v25 = vshll.u32 %v459_v41, 8 }
  0xbd   : > { %v494_v29 = vsel %vm484_vm15, %v491_v49, %v493_v20  ;;  %v497_v26 = vsel %vm485_vm14, %v479_v11, %v496_v24  ;;  %v488_v53 = vsel %vm486_vm12, %v476_v10, 2102212464  ;;  %v467_v10 = vshrl.u32 %v1690_v37, %v1890_v23 }
  0xbe   : > { %v362_v17 = vsel %vm360_vm13, %v361_v46, %v357_v9  ;;  %v525_v28 = vshrl.u32 %v494_v29, 16  ;;  %v498_v31 = vsel %vm484_vm15, %v495_v21, %v497_v26  ;;  %v500_v32 = vand.u32 65535, %v1945_v25 }
  0xbf   : > { %v363_v22 = vadd.s32 %v362_v17, %v358_v52  ;;  %v524_v33 = vand.u32 65535, %v494_v29  ;;  %v501_v34 = vshrl.u32 %v1945_v25, 16  ;;  %v502_v38 = vand.u32 65535, %v498_v31 }
  0xc0   : > { %v503_v40 = vshrl.u32 %v498_v31, 16  ;;  %v527_v43 = vmul.u32 %v525_v28, %v500_v32  ;;  %v487_v17 = vsel %vm483_vm11, %v467_v10, %v1905_v60  ;;  %v489_v20 = vsel %vm485_vm14, %v1910_v0, %v488_v53 }
  0xc1   : > { %v364_v30 = vadd.s32 536870912, %v363_v22  ;;  %v506_v45 = vmul.u32 %v502_v38, %v501_v34  ;;  %v528_v36 = vmul.u32 %v524_v33, %v501_v34  ;;  %v504_v48 = vmul.u32 %v502_v38, %v500_v32 }
  0xc2   : > { %v505_v44 = vmul.u32 %v503_v40, %v500_v32  ;;  %v530_v35 = vshll.u32 %v527_v43, 16  ;;  %v507_v54 = vmul.u32 %v503_v40, %v501_v34  ;;  %v526_v55 = vmul.u32 %v524_v33, %v500_v32 }
  0xc3   : > { %v1953_v42 = vshrl.u32 %v364_v30, 30  ;;  %v510_v56 = vshll.u32 %v506_v45, 16  ;;  %v529_v58 = vmul.u32 %v525_v28, %v501_v34  ;;  %v532_v62 = vshll.u32 %v528_v36, 16 }
  0xc4   : > { %v508_v50 = vshll.u32 %v505_v44, 16  ;;  %vm534_vm4 = vc.u32 %v526_v55, %v530_v35  ;;  %v536_v2 = vadd.s32 %v530_v35, %v526_v55  ;;  %v509_v39 = vshrl.u32 %v505_v44, 16 }
  0xc5   : > { %v366_v47 = vshll.u32 %v1953_v42, 30  ;;  %v535_v7 = vsel %vm534_vm4, 1, %v1689_v1  ;;  %v511_v11 = vshrl.u32 %v506_v45, 16  ;;  %v531_v52 = vshrl.u32 %v527_v43, 16 }
  0xc6   : > { %vm512_vm1 = vc.u32 %v504_v48, %v508_v50  ;;  %v514_v57 = vadd.s32 %v508_v50, %v504_v48  ;;  %v537_v41 = vadd.s32 %v535_v7, %v529_v58  ;;  %vm538_vm5 = vc.u32 %v536_v2, %v532_v62 }
  0xc7   : > { %v367_v51 = vsub.s32 %v363_v22, %v366_v47  ;;  %v513_v61 = vsel %vm512_vm1, 1, %v1689_v1  ;;  %v539_v15 = vsel %vm538_vm5, 1, %v1689_v1  ;;  %v533_v22 = vshrl.u32 %v528_v36, 16 }
  0xc8   : > { %v515_v63 = vadd.s32 %v513_v61, %v507_v54  ;;  %vm516_vm3 = vc.u32 %v514_v57, %v510_v56  ;;  %v541_v6 = vadd.s32 %v539_v15, %v537_v41  ;;  %v359_v37 = vadd.s32 %v1920_v14, %v1918_v13 }
  0xc9   : > { %vm368_vm2 = vcmp.lt.s32.totalorder %v367_v51, 0  ;;  %v369_v59 = vsub.s32 0, %v367_v51  ;;  %v517_v4 = vsel %vm516_vm3, 1, %v1689_v1  ;;  %v540_v23 = vadd.s32 %v536_v2, %v532_v62 }
  0xca   : > { %v519_v9 = vadd.s32 %v517_v4, %v515_v63  ;;  %v542_v29 = vadd.s32 %v541_v6, %v531_v52  ;;  %v490_v28 = vsel %vm484_vm15, %v487_v17, %v489_v20  ;;  %vm267_vm8 = vcmp.lt.s32.totalorder %v1855_v16, 0  ;;  %v1991_v20 = vpop.eup %1577 }
  0xcb   : > { %v370_v3 = vsel %vm368_vm2, %v369_v59, %v367_v51  ;;  %v544_v33 = vmul.u32 %v1945_v25, %v490_v28  ;;  %vm266_vm9 = vcmp.le.f32.partialorder %v1859_v18, 0.7853982  ;;  %vm453_vm12 = vcmp.lt.s32.totalorder %v1864_v27, 0 }
  0xcc   : > { %v371_v8 = vclz %v370_v3  ;;  %v520_v49 = vadd.s32 %v519_v9, %v509_v39  ;;  %v543_v30 = vadd.s32 %v542_v29, %v533_v22  ;;  %vm452_vm13 = vcmp.le.f32.partialorder %v1883_v5, 0.7853982 }
  0xcd   : > { %vm426_vm15 = vweird.f32 %v1991_v20  ;;  %vm408_vm3 = vweird.f32 %v1855_v16 }
  0xce   : > { %v1448_v46 = vadd.s32 4294967294, %v371_v8  ;;  %v521_v21 = vadd.s32 %v520_v49, %v511_v11  ;;  %v547_v0 = vadd.s32 1, %v543_v30  ;;  %v389_v11 = vsub.s32 4, %v1953_v42  ;;  %vm2020_vm4 = vmor %vm408_vm3, %vm426_vm15 }
  0xd0   : > { %vm1449_vm6 = vcmp.lt.s32.totalorder %v1448_v46, 0  ;;  %vm546_vm7 = vc.u32 %v521_v21, %v540_v23  ;;  %v545_v62 = vadd.s32 %v540_v23, %v521_v21  ;;  %v390_v17 = vsel %vm267_vm8, %v389_v11, %v1953_v42 }
  0xd1   : > { %v374_v1 = vsel %vm1449_vm6, 0, %v1448_v46  ;;  %v548_v40 = vsel %vm546_vm7, %v547_v0, %v543_v30  ;;  %v392_v29 = vsel %vm266_vm9, 0, %v390_v17  ;;  %v421_v23 = vmul.f32 %v1991_v20, %v1855_v16 }
  0xd2   : > { %v375_v24 = vsub.s32 32, %v374_v1  ;;  %v379_v26 = vsub.s32 4294967266, %v374_v1  ;;  %v376_v60 = vshll.u32 %v367_v51, %v374_v1  ;;  %v549_v43 = vadd.s32 %v548_v40, %v544_v33 }
  0xd3   : > { %v409_v28 = vadd.s32 3, %v392_v29  ;;  %v422_v0 = vsub.f32 1.0, %v421_v23  ;;  %v617_v11 = vand.u32 2147483648, %v1864_v27  ;;  %vm430_vm6 = vcmp.eq.f32.partialorder %v1859_v18, 8.507059e+37 }
  0xd4   : > { %v377_v31 = vshrl.u32 %v359_v37, %v375_v24  ;;  %v380_v32 = vadd.s32 127, %v379_v26  ;;  %v550_v14 = vadd.s32 536870912, %v549_v43  ;;  %v1998_v24 = vpop.eup %1579  ;;  %vm594_vm7 = vweird.f32 %v1864_v27 }
  0xd5   : > { %v607_v33 = vmul.f32 %v1998_v24, %v1864_v27  ;;  %vm612_vm5 = vweird.f32 %v1998_v24 }
  0xd6   : > { %v378_v34 = vor.u32 %v377_v31, %v376_v60  ;;  %v381_v38 = vshll.u32 %v380_v32, 23  ;;  %v1975_v47 = vshrl.u32 %v550_v14, 30 }
  0xd8   : > { %v382_v13 = vor.u32 4788187, %v381_v38  ;;  %v385_v45 = vcvt.s32.f32 %v378_v34  ;;  %v552_v36 = vshll.u32 %v1975_v47, 30  ;;  %v575_v30 = vsub.s32 4, %v1975_v47 }
  0xda   : > { %v383_v44 = vand.u32 2147483647, %v382_v13  ;;  %v553_v50 = vsub.s32 %v549_v43, %v552_v36  ;;  %v410_v43 = vand.u32 3, %v409_v28  ;;  %v576_v13 = vsel %vm453_vm12, %v575_v30, %v1975_v47 }
  0xdb   : > { %v608_v36 = vsub.f32 1.0, %v607_v33 }
  0xdc   : > { %v386_v19 = vmul.f32 %v385_v45, %v383_v44  ;;  %vm554_vm10 = vcmp.lt.s32.totalorder %v553_v50, 0  ;;  %v555_v51 = vsub.s32 0, %v553_v50  ;;  %vm412_vm14 = vcmp.eq.s32.totalorder %v410_v43, 0 }
  0xdd   : > { %vm415_vm1 = vcmp.eq.s32.totalorder %v410_v43, 2  ;;  %vm411_vm2 = vcmp.lt.s32.totalorder %v410_v43, 2 }
  0xde   : > { %v387_v48 = vxor.u32 2147483648, %v386_v19  ;;  %v556_v54 = vsel %vm554_vm10, %v555_v51, %v553_v50  ;;  %v431_v51 = vand.u32 2147483648, %v1855_v16 }
  0xdf   : > { %v557_v56 = vclz %v556_v54 }
  0xe0   : > { %v388_v25 = vsel %vm267_vm8, %v387_v48, %v386_v19  ;;  %v423_v19 = vmul.f32 %v1991_v20, %v422_v0  ;;  %vm613_vm8 = vmor %vm594_vm7, %vm612_vm5 }
  0xe1   : > { %v391_v35 = vsel %vm266_vm9, %v1855_v16, %v388_v25  ;;  %v1451_v57 = vadd.s32 4294967294, %v557_v56 }
  0xe2   : > { %v393_v53 = vmul.f32 %v391_v35, %v391_v35 }
  0xe3   : > { %vm1452_vm11 = vcmp.lt.s32.totalorder %v1451_v57, 0 }
  0xe4   : > { %v401_v55 = vmul.f32 -0.00019511016, %v393_v53  ;;  %v394_v59 = vmul.f32 -0.001358992, %v393_v53  ;;  %v560_v61 = vsel %vm1452_vm11, 0, %v1451_v57  ;;  %v609_v57 = vmul.f32 %v1998_v24, %v608_v36 }
  0xe5   : > { %v561_v63 = vsub.s32 32, %v560_v61  ;;  %v565_v3 = vsub.s32 4294967266, %v560_v61  ;;  %v562_v7 = vshll.u32 %v553_v50, %v560_v61  ;;  %v578_v50 = vsel %vm452_vm13, 0, %v576_v13 }
  0xe6   : > { %v402_v58 = vadd.f32 0.008332121, %v401_v55  ;;  %v395_v4 = vadd.f32 0.041655596, %v394_v59  ;;  %v424_v55 = vadd.f32 %v1991_v20, %v423_v19  ;;  %v595_v56 = vadd.s32 3, %v578_v50 }
  0xe7   : > { %v563_v39 = vshrl.u32 %v545_v62, %v561_v63  ;;  %v566_v8 = vadd.s32 127, %v565_v3 }
  0xe8   : > { %v403_v2 = vmul.f32 %v402_v58, %v393_v53  ;;  %v396_v15 = vmul.f32 %v395_v4, %v393_v53  ;;  %v428_v4 = vsel %vm2020_vm4, %v1991_v20, %v424_v55  ;;  %v618_v20 = vor.u32 1.1754944e-38, %v617_v11 }
  0xe9   : > { %v564_v41 = vor.u32 %v563_v39, %v562_v7  ;;  %v567_v10 = vshll.u32 %v566_v8, 23  ;;  %v439_v7 = vpop.permute.xlu1 %438  ;;  %v596_v8 = vand.u32 3, %v595_v56 }
  0xea   : > { %v404_v9 = vadd.f32 -0.16666654, %v403_v2  ;;  %v397_v21 = vadd.f32 -0.4999988, %v396_v15  ;;  %v432_v2 = vor.u32 1.1754944e-38, %v431_v51 }
  0xeb   : > { %v568_v46 = vor.u32 4788187, %v567_v10  ;;  %v571_v6 = vcvt.s32.f32 %v564_v41  ;;  %vm598_vm9 = vcmp.eq.s32.totalorder %v596_v8, 0  ;;  %vm601_vm10 = vcmp.eq.s32.totalorder %v596_v8, 2 }
  0xec   : > { %v405_v49 = vmul.f32 %v404_v9, %v393_v53  ;;  %v398_v26 = vmul.f32 %v397_v21, %v393_v53  ;;  %v610_v9 = vadd.f32 %v1998_v24, %v609_v57  ;;  %v433_v15 = vsel %vm430_vm6, %v432_v2, %v428_v4 }
  0xed   : > { %v569_v52 = vand.u32 2147483647, %v568_v46  ;;  %vm597_vm11 = vcmp.lt.s32.totalorder %v596_v8, 2 }
  0xee   : > { %v406_v37 = vadd.f32 1.0, %v405_v49  ;;  %v399_v34 = vadd.f32 1.0, %v398_v26 }
  0xef   : > { %v572_v22 = vmul.f32 %v571_v6, %v569_v52  ;;  %v614_v52 = vsel %vm613_vm8, %v1998_v24, %v610_v9 }
  0xf0   : > { %v407_v31 = vmul.f32 %v406_v37, %v391_v35  ;;  %v416_v48 = vxor.u32 2147483648, %v399_v34 }
  0xf1   : > { %v573_v1 = vxor.u32 2147483648, %v572_v22 }
  0xf2   : > { %v413_v14 = vxor.u32 2147483648, %v407_v31  ;;  %v417_v58 = vsel %vm415_vm1, %v416_v48, %v407_v31 }
  0xf3   : > { %v574_v42 = vsel %vm453_vm12, %v573_v1, %v572_v22  ;;  %vm616_vm12 = vcmp.eq.f32.partialorder %v1883_v5, 8.507059e+37  ;;  %v625_v1 = vpop.permute.xlu1 %624 }
  0xf4   : > { %v577_v60 = vsel %vm452_vm13, %v1864_v27, %v574_v42  ;;  %v414_v53 = vsel %vm412_vm14, %v399_v34, %v413_v14  ;;  %v619_v29 = vsel %vm616_vm12, %v618_v20, %v614_v52  ;;  %vm629_vm13 = vcmask 203776   ;;  %v1576_v34 = vld [vmem:[%s2266_s3] ss:$0 sm:$0xff] }
  0xf5   : > { %v579_v32 = vmul.f32 %v577_v60, %v577_v60  ;;  %v418_v62 = vsel %vm411_vm2, %v414_v53, %v417_v58 }
  0xf6   : > { %v419_v41 = vsel %vm408_vm3, nan, %v418_v62 }
  0xf7   : > { %v580_v38 = vmul.f32 -0.001358992, %v579_v32  ;;  %v587_v40 = vmul.f32 -0.00019511016, %v579_v32  ;;  %v434_v49 = vmul.f32 %v433_v15, %v419_v41 }
  0xf9   : > { %v581_v44 = vadd.f32 0.041655596, %v580_v38  ;;  %v588_v45 = vadd.f32 0.008332121, %v587_v40  ;;  %v435_v18 = vsel %vm263_vm0, 1.0, %v434_v49 }
  0xfa   : > { %v441_v23 = vmul.f32 %v439_v7, %v435_v18 }
  0xfb   : > { %v582_v25 = vmul.f32 %v581_v44, %v579_v32  ;;  %v589_v35 = vmul.f32 %v588_v45, %v579_v32 }
  0xfd   : > { %v583_v54 = vadd.f32 -0.4999988, %v582_v25  ;;  %v590_v47 = vadd.f32 -0.16666654, %v589_v35 }
  0xff   : > { %v584_v59 = vmul.f32 %v583_v54, %v579_v32  ;;  %v591_v61 = vmul.f32 %v590_v47, %v579_v32 }
 0x101   : > { %v585_v3 = vadd.f32 1.0, %v584_v59  ;;  %v592_v39 = vadd.f32 1.0, %v591_v61 }
 0x103   : > { %v593_v16 = vmul.f32 %v592_v39, %v577_v60  ;;  %v602_v10 = vxor.u32 2147483648, %v585_v3 }
 0x105   : > { %v599_v46 = vxor.u32 2147483648, %v593_v16  ;;  %v603_v17 = vsel %vm601_vm10, %v602_v10, %v593_v16 }
 0x107   : > { %v600_v6 = vsel %vm598_vm9, %v585_v3, %v599_v46 }
 0x108   : > { %v604_v21 = vsel %vm597_vm11, %v600_v6, %v603_v17 }
 0x109   : > { %v605_v22 = vsel %vm594_vm7, nan, %v604_v21 }
 0x10a   : > { %v620_v27 = vmul.f32 %v619_v29, %v605_v22 }
 0x10c   : > { %v621_v37 = vsel %vm263_vm0, 1.0, %v620_v27 }
 0x10d   : > { %v627_v26 = vmul.f32 %v625_v1, %v621_v37 }
 0x10f   : > { %v628_v24 = vsub.f32 %v627_v26, %v441_v23 }
 0x111   : > { %v630_v42 = vsel %vm629_vm13, %v628_v24, -inf }
 0x112   : > { %631 = vmax.xlane.f32.xlu2 %v630_v42 }
 0x185   : > { %v632_v28 = vpop.xlane.xlu2 %631 }
 0x186   : > { %1581 = vrcp.f32 %v632_v28  ;;  %v644_v31 = vand.u32 2147483648, %v632_v28  ;;  %v642_v0 = vand.u32 2147483647, %v632_v28  ;;  %vm638_vm15 = vweird.f32 %v632_v28 }
 0x188   : > { %v645_v12 = vor.u32 1.1754944e-38, %v644_v31  ;;  %vm643_vm1 = vcmp.eq.f32.partialorder %v642_v0, 8.507059e+37 }
 0x18c   : > { %v1582_v5 = vpop.eup %1581 }
 0x18d   : > { %v634_v30 = vmul.f32 %v1582_v5, %v632_v28  ;;  %vm639_vm14 = vweird.f32 %v1582_v5 }
 0x18e   : > { %vm640_vm0 = vmor %vm638_vm15, %vm639_vm14 }
 0x18f   : > { %v635_v60 = vsub.f32 1.0, %v634_v30 }
 0x191   : > { %v636_v32 = vmul.f32 %v1582_v5, %v635_v60 }
 0x193   : > { %v637_v33 = vadd.f32 %v1582_v5, %v636_v32 }
 0x195   : > { %v641_v38 = vsel %vm640_vm0, %v1582_v5, %v637_v33 }
 0x196   : > { %v646_v40 = vsel %vm643_vm1, %v645_v12, %v641_v38 }
 0x197   : > { %v647_v43 = vmul.f32 %v646_v40, %v628_v24 }
 0x199   : > { %v652_v13 = vmul.f32 %v1576_v34, %v647_v43 }
 0x19b   : > { %653 = vst.msk [vmem:[#allocation2] sm:$0xff] %vm629_vm13, %v652_v13 }
 0x19c PF: > { %v1696_v44 = vmov 2   ;;  %v1697_v45 = vmov 0   ;;  %v1698_v19 = vmov 1   ;;  %v1699_v36 = vmov 3   ;;  %s1453_s24 = sshll.u32 %s1679_s21, 7  ;;  %s1705_s11 = smov 126  }
 0x19d   : > { %1585 = vset.pattern.permute.xlu1 %v1696_v44  ;;  %1583 = vset.pattern.permute.xlu0 %v1697_v45  ;;  %v1700_v48 = vmov 4   ;;  %v1701_v50 = vmov 5   ;;  %v1702_v25 = vmov 6   ;;  %v1703_v35 = vmov 7   ;;  %s655_s25 = sshra.s32 %s1453_s24, 7  ;;  %s1706_s12 = smov 127  }
 0x19e   : > { %v1704_v51 = vmov 8   ;;  %s1454_s27 = sshll.u32 %s655_s25, 1  ;;  %vm665_vm2 = vcmask 1040384   ;;  %vm667_vm3 = vcmask 1042434   ;;  %vm669_vm4 = vcmask 1041408   ;;  %s1709_s13 = smov 125  }
 0x19f   : > { %s658_s10 = scalar_lea.vmem %s2267_s4, %s1454_s27  ;;  %vm671_vm5 = vcmask 1041409   ;;  %vm673_vm6 = vcmask 1043459   ;;  %vm675_vm7 = vcmask 1042433   ;;  %v1707_v46 = vmov 9   ;;  %s1712_s14 = smov 124  }
 0x1a0   : > { %v659_v53 = vld [vmem:[%s658_s10] sm:$0xf]  ;;  %v1708_v17 = vmov 10   ;;  %v1710_v22 = vmov 11   ;;  %v1711_v37 = vmov 12   ;;  %v1713_v42 = vmov 13  }
 0x1a1   : > { %v662_v54 = vrot.slane %v659_v53, 1  ;;  %v663_v47 = vrot.slane %v659_v53, 2  ;;  %v664_v55 = vrot.slane %v659_v53, 3  ;;  %s1714_s15 = smov 123   ;;  %v1715_v60 = vmov 14   ;;  %s1716_s16 = smov 122  }
 0x1a2   : > { %v2043_v14 = vld [vmem:[#allocation2] sm:$0xff]  ;;  %v1717_v40 = vmov 15   ;;  %s1718_s17 = smov 121   ;;  %vm715_vm8 = vcmask 1039360   ;;  %vm742_vm9 = vcmask 1031168   ;;  %s1721_s24 = smov 120  }
 0x1a3   : > { %723 = vperm.xlu1 %1585, %v2043_v14   ;;  %680 = vperm.xlu0 %1583, %v2043_v14   ;;  %v666_v56 = vsel %vm665_vm2, %v659_v53, %v662_v54  ;;  %v668_v57 = vsel %vm667_vm3, %v663_v47, %v664_v55  ;;  %v672_v61 = vsel %vm671_vm5, %v659_v53, %v662_v54  ;;  %s1723_s25 = smov 119   ;;  %vm769_vm10 = vcmask 1022976   ;;  %s1726_s27 = smov 118  }
 0x1a4   : > { %v670_v58 = vsel %vm669_vm4, %v666_v56, %v668_v57  ;;  %v674_v62 = vsel %vm673_vm6, %v663_v47, %v664_v55  ;;  %v1720_v56 = vmov 17   ;;  %vm796_vm11 = vcmask 1014784   ;;  %s1727_s29 = smov 117   ;;  %s1728_s8 = smov 116  }
 0x1a5   : > { %v2057_v59 = vperm.slane %v670_v58, 1  ;;  %v676_v3 = vsel %vm675_vm7, %v672_v61, %v674_v62  ;;  %v2062_v7 = vperm.slane %v670_v58, 0  ;;  %vm823_vm12 = vcmask 1006592   ;;  %s1729_s10 = smov 115  }
 0x1a6   : > { %v677_v4 = vrot.slane %v676_v3, 1  ;;  %vm850_vm13 = vcmask 998400   ;;  %vm877_vm14 = vcmask 990208   ;;  %vm904_vm15 = vcmask 982016  }
 0x1a7   : > { %vm931_vm0 = vcmask 973824   ;;  %vm958_vm1 = vcmask 965632   ;;  %vm985_vm2 = vcmask 957440   ;;  %vm1012_vm3 = vcmask 949248  }
 0x1a8   : > { %v2064_v8 = vperm.slane %v677_v4, 0  ;;  %v2069_v10 = vperm.slane %v677_v4, 1  ;;  %vm1039_vm4 = vcmask 941056   ;;  %vm1066_vm5 = vcmask 932864  }
 0x1a9   : > { %vm1093_vm6 = vcmask 924672   ;;  %vm1120_vm7 = vcmask 916480  }
 0x1ab   : > { %1584 = vset.pattern.permute.xlu0 %v1698_v19 }
 0x1ac   : > { %692 = vperm.xlu0 %1584, %v2043_v14  }
 0x1b4   : > { %1586 = vset.pattern.permute.xlu0 %v1699_v36 }
 0x1b5   : > { %750 = vperm.xlu0 %1586, %v2043_v14  }
 0x1bd   : > { %1587 = vset.pattern.permute.xlu0 %v1700_v48  ;;  %v1719_v48 = vmov 16  }
 0x1be   : > { %777 = vperm.xlu0 %1587, %v2043_v14  }
 0x1c6   : > { %1588 = vset.pattern.permute.xlu0 %v1701_v50 }
 0x1c7   : > { %804 = vperm.xlu0 %1588, %v2043_v14  }
 0x1cf   : > { %1589 = vset.pattern.permute.xlu0 %v1702_v25 }
 0x1d0   : > { %831 = vperm.xlu0 %1589, %v2043_v14  }
 0x1d8   : > { %1590 = vset.pattern.permute.xlu0 %v1703_v35 }
 0x1d9   : > { %858 = vperm.xlu0 %1590, %v2043_v14  }
 0x1e1   : > { %1591 = vset.pattern.permute.xlu0 %v1704_v51 }
 0x215   : > { %v724_v63 = vpop.permute.xlu1 %723  ;;  %v2059_v2 = vpop.permute.xlu0 %680 }
 0x216   : > { %v727_v39 = vmul.f32 %v724_v63, %v2057_v59  ;;  %v726_v49 = vmul.f32 %v724_v63, %v2062_v7  ;;  %v728_v52 = vmul.f32 %v724_v63, %v2064_v8  ;;  %v729_v21 = vmul.f32 %v724_v63, %v2069_v10 }
 0x217   : > { %v688_v50 = vmul.f32 %v2064_v8, %v2059_v2  ;;  %v687_v3 = vmul.f32 %v2062_v7, %v2059_v2 }
 0x218   : > { %736 = vrot.lane.b32.xlu0 %v727_v39, %s1705_s11 }
 0x21e   : > { %v693_v9 = vpop.permute.xlu0 %692 }
 0x21f   : > { %v701_v41 = vmul.f32 %v693_v9, %v2064_v8  ;;  %v699_v16 = vmul.f32 %v693_v9, %v2062_v7  ;;  %v702_v11 = vmul.f32 %v2069_v10, %v693_v9  ;;  %v700_v15 = vmul.f32 %v2057_v59, %v693_v9 }
 0x220   : > { %885 = vperm.xlu0 %1591, %v2043_v14  }
 0x221   : > { %711 = vrot.lane.b32.xlu2 %v701_v41, %s1706_s12  ;;  %707 = vrot.lane.b32.xlu1 %v699_v16, %s1706_s12 }
 0x227   : > { %v751_v6 = vpop.permute.xlu0 %750 }
 0x228   : > { %1592 = vset.pattern.permute.xlu0 %v1707_v46  ;;  %v753_v20 = vmul.f32 %v751_v6, %v2062_v7  ;;  %v754_v29 = vmul.f32 %v751_v6, %v2057_v59  ;;  %v755_v18 = vmul.f32 %v751_v6, %v2064_v8  ;;  %v756_v23 = vmul.f32 %v751_v6, %v2069_v10 }
 0x229   : > { %713 = vrot.lane.b32.xlu2 %v702_v11, %s1706_s12  ;;  %709 = vrot.lane.b32.xlu1 %v700_v15, %s1706_s12  ;;  %v1722_v46 = vmov 18   ;;  %s1731_s12 = smov 113  }
 0x22a   : > { %912 = vperm.xlu0 %1592, %v2043_v14  }
 0x230   : > { %v778_v27 = vpop.permute.xlu0 %777 }
 0x231   : > { %734 = vrot.lane.b32.xlu2 %v726_v49, %s1705_s11  ;;  %738 = vrot.lane.b32.xlu1 %v728_v52, %s1705_s11  ;;  %v780_v1 = vmul.f32 %v778_v27, %v2062_v7  ;;  %v781_v26 = vmul.f32 %v778_v27, %v2057_v59  ;;  %v782_v24 = vmul.f32 %v778_v27, %v2064_v8 }
 0x232   : > { %1593 = vset.pattern.permute.xlu0 %v1708_v17  ;;  %v783_v30 = vmul.f32 %v778_v27, %v2069_v10 }
 0x233   : > { %939 = vperm.xlu0 %1593, %v2043_v14  }
 0x239   : > { %740 = vrot.lane.b32.xlu2 %v729_v21, %s1705_s11  ;;  %761 = vrot.lane.b32.xlu1 %v753_v20, %s1709_s13  ;;  %v805_v28 = vpop.permute.xlu0 %804  ;;  %s1730_s11 = smov 114  }
 0x23a   : > { %v807_v5 = vmul.f32 %v805_v28, %v2062_v7  ;;  %v808_v31 = vmul.f32 %v805_v28, %v2057_v59  ;;  %v809_v32 = vmul.f32 %v805_v28, %v2064_v8  ;;  %v810_v12 = vmul.f32 %v805_v28, %v2069_v10 }
 0x23b   : > { %1594 = vset.pattern.permute.xlu0 %v1710_v22  ;;  %v1724_v22 = vmov 19  }
 0x23c   : > { %966 = vperm.xlu0 %1594, %v2043_v14  }
 0x241   : > { %763 = vrot.lane.b32.xlu2 %v754_v29, %s1709_s13  ;;  %765 = vrot.lane.b32.xlu1 %v755_v18, %s1709_s13 }
 0x242   : > { %v832_v0 = vpop.permute.xlu0 %831 }
 0x243   : > { %v834_v33 = vmul.f32 %v832_v0, %v2062_v7  ;;  %v835_v34 = vmul.f32 %v832_v0, %v2057_v59  ;;  %v836_v38 = vmul.f32 %v832_v0, %v2064_v8  ;;  %v837_v44 = vmul.f32 %v832_v0, %v2069_v10 }
 0x244   : > { %1595 = vset.pattern.permute.xlu0 %v1711_v37 }
 0x245   : > { %993 = vperm.xlu0 %1595, %v2043_v14  }
 0x249   : > { %767 = vrot.lane.b32.xlu2 %v756_v23, %s1709_s13  ;;  %788 = vrot.lane.b32.xlu1 %v780_v1, %s1712_s14  ;;  %s1732_s13 = smov 112  }
 0x24b   : > { %v859_v43 = vpop.permute.xlu0 %858 }
 0x24c   : > { %v861_v13 = vmul.f32 %v859_v43, %v2062_v7  ;;  %v862_v19 = vmul.f32 %v859_v43, %v2057_v59  ;;  %v863_v36 = vmul.f32 %v859_v43, %v2064_v8  ;;  %v864_v53 = vmul.f32 %v859_v43, %v2069_v10 }
 0x24d   : > { %1596 = vset.pattern.permute.xlu0 %v1713_v42 }
 0x24e   : > { %1020 = vperm.xlu0 %1596, %v2043_v14  }
 0x251   : > { %790 = vrot.lane.b32.xlu2 %v781_v26, %s1712_s14  ;;  %792 = vrot.lane.b32.xlu1 %v782_v24, %s1712_s14  ;;  %v1725_v24 = vmov 20  }
 0x256   : > { %1597 = vset.pattern.permute.xlu0 %v1715_v60 }
 0x257   : > { %1047 = vperm.xlu0 %1597, %v2043_v14  }
 0x259   : > { %794 = vrot.lane.b32.xlu2 %v783_v30, %s1712_s14  ;;  %815 = vrot.lane.b32.xlu1 %v807_v5, %s1714_s15  ;;  %s1733_s14 = smov 111  }
 0x25f   : > { %1598 = vset.pattern.permute.xlu0 %v1717_v40 }
 0x260   : > { %1074 = vperm.xlu0 %1598, %v2043_v14  }
 0x261   : > { %817 = vrot.lane.b32.xlu2 %v808_v31, %s1714_s15  ;;  %819 = vrot.lane.b32.xlu1 %v809_v32, %s1714_s15 }
 0x268   : > { %1599 = vset.pattern.permute.xlu0 %v1719_v48 }
 0x269   : > { %821 = vrot.lane.b32.xlu2 %v810_v12, %s1714_s15  ;;  %842 = vrot.lane.b32.xlu1 %v834_v33, %s1716_s16  ;;  %s1734_s15 = smov 108  }
 0x26a   : > { %1101 = vperm.xlu0 %1599, %v2043_v14  }
 0x271   : > { %844 = vrot.lane.b32.xlu2 %v835_v34, %s1716_s16  ;;  %846 = vrot.lane.b32.xlu1 %v836_v38, %s1716_s16 }
 0x272   : > { %1600 = vset.pattern.permute.xlu0 %v1720_v56 }
 0x273   : > { %1128 = vperm.xlu0 %1600, %v2043_v14  }
 0x279   : > { %848 = vrot.lane.b32.xlu2 %v837_v44, %s1716_s16  ;;  %869 = vrot.lane.b32.xlu1 %v861_v13, %s1718_s17  ;;  %s1737_s16 = smov 110  }
 0x27b   : > { %v712_v45 = vpop.permute.xlu2 %711  ;;  %1601 = vset.pattern.permute.xlu0 %v1722_v46 }
 0x27c   : > { %1155 = vperm.xlu0 %1601, %v2043_v14  }
 0x281   : > { %871 = vrot.lane.b32.xlu2 %v862_v19, %s1718_s17  ;;  %873 = vrot.lane.b32.xlu1 %v863_v36, %s1718_s17 }
 0x283   : > { %v714_v25 = vpop.permute.xlu2 %713 }
 0x284   : > { %v717_v35 = vsel %vm715_vm8, %v712_v45, %v714_v25  ;;  %1602 = vset.pattern.permute.xlu0 %v1724_v22 }
 0x285   : > { %v721_v51 = vadd.f32 %v717_v35, %v688_v50  ;;  %1182 = vperm.xlu0 %1602, %v2043_v14  }
 0x289   : > { %875 = vrot.lane.b32.xlu2 %v864_v53, %s1718_s17  ;;  %s1739_s17 = smov 109  }
 0x28a   : > { %v737_v54 = vpop.permute.xlu0 %736 }
 0x28b   : > { %v735_v47 = vpop.permute.xlu2 %734 }
 0x28c   : > { %v743_v55 = vsel %vm742_vm9, %v735_v47, %v737_v54 }
 0x28d   : > { %1603 = vset.pattern.permute.xlu0 %v1725_v24 }
 0x28e   : > { %1209 = vperm.xlu0 %1603, %v2043_v14  }
 0x292   : > { %v886_v57 = vpop.permute.xlu0 %885 }
 0x293   : > { %v741_v58 = vpop.permute.xlu2 %740  ;;  %v708_v61 = vpop.permute.xlu1 %707  ;;  %v889_v62 = vmul.f32 %v886_v57, %v2057_v59  ;;  %v888_v63 = vmul.f32 %v886_v57, %v2062_v7  ;;  %v891_v9 = vmul.f32 %v886_v57, %v2069_v10  ;;  %v890_v41 = vmul.f32 %v886_v57, %v2064_v8 }
 0x295   : > { %898 = vrot.lane.b32.xlu2 %v889_v62, %s1721_s24  ;;  %896 = vrot.lane.b32.xlu1 %v888_v63, %s1721_s24 }
 0x29b   : > { %v764_v39 = vpop.permute.xlu2 %763  ;;  %v710_v4 = vpop.permute.xlu1 %709 }
 0x29c   : > { %v716_v16 = vsel %vm715_vm8, %v708_v61, %v710_v4  ;;  %v913_v15 = vpop.permute.xlu0 %912  ;;  %vm1147_vm8 = vcmask 908288  }
 0x29d   : > { %v720_v11 = vadd.f32 %v716_v16, %v687_v3  ;;  %902 = vrot.lane.b32.xlu2 %v891_v9, %s1721_s24  ;;  %900 = vrot.lane.b32.xlu1 %v890_v41, %s1721_s24  ;;  %v916_v52 = vmul.f32 %v913_v15, %v2057_v59  ;;  %v915_v2 = vmul.f32 %v913_v15, %v2062_v7  ;;  %s1741_s24 = smov 107  }
 0x29e   : > { %v918_v27 = vmul.f32 %v913_v15, %v2069_v10  ;;  %v917_v37 = vmul.f32 %v913_v15, %v2064_v8 }
 0x29f   : > { %v747_v49 = vadd.f32 %v743_v55, %v720_v11 }
 0x2a3   : > { %v768_v6 = vpop.permute.xlu2 %767  ;;  %v739_v17 = vpop.permute.xlu1 %738 }
 0x2a4   : > { %v744_v20 = vsel %vm742_vm9, %v739_v17, %v741_v58  ;;  %vm1174_vm9 = vcmask 900096  }
 0x2a5   : > { %v748_v21 = vadd.f32 %v744_v20, %v721_v51  ;;  %925 = vrot.lane.b32.xlu2 %v916_v52, %s1723_s25  ;;  %923 = vrot.lane.b32.xlu1 %v915_v2, %s1723_s25  ;;  %v940_v26 = vpop.permute.xlu0 %939 }
 0x2a6   : > { %v943_v42 = vmul.f32 %v940_v26, %v2057_v59  ;;  %v942_v28 = vmul.f32 %v940_v26, %v2062_v7  ;;  %v945_v33 = vmul.f32 %v940_v26, %v2069_v10  ;;  %v944_v12 = vmul.f32 %v940_v26, %v2064_v8 }
 0x2ab   : > { %v791_v29 = vpop.permute.xlu2 %790  ;;  %v762_v18 = vpop.permute.xlu1 %761 }
 0x2ac   : > { %v770_v1 = vsel %vm769_vm10, %v762_v18, %v764_v39 }
 0x2ad   : > { %v774_v23 = vadd.f32 %v770_v1, %v747_v49  ;;  %929 = vrot.lane.b32.xlu2 %v918_v27, %s1723_s25  ;;  %927 = vrot.lane.b32.xlu1 %v917_v37, %s1723_s25  ;;  %s1742_s25 = smov 106  }
 0x2ae   : > { %v967_v40 = vpop.permute.xlu0 %966 }
 0x2af   : > { %v970_v43 = vmul.f32 %v967_v40, %v2057_v59  ;;  %v969_v13 = vmul.f32 %v967_v40, %v2062_v7  ;;  %v972_v25 = vmul.f32 %v967_v40, %v2069_v10  ;;  %v971_v35 = vmul.f32 %v967_v40, %v2064_v8 }
 0x2b3   : > { %v795_v5 = vpop.permute.xlu2 %794  ;;  %v766_v30 = vpop.permute.xlu1 %765 }
 0x2b4   : > { %v771_v60 = vsel %vm769_vm10, %v766_v30, %v768_v6  ;;  %vm1201_vm10 = vcmask 891904  }
 0x2b5   : > { %v775_v31 = vadd.f32 %v771_v60, %v748_v21  ;;  %952 = vrot.lane.b32.xlu2 %v943_v42, %s1726_s27  ;;  %950 = vrot.lane.b32.xlu1 %v942_v28, %s1726_s27 }
 0x2b7   : > { %v994_v54 = vpop.permute.xlu0 %993 }
 0x2b8   : > { %v997_v47 = vmul.f32 %v994_v54, %v2057_v59  ;;  %v996_v55 = vmul.f32 %v994_v54, %v2062_v7  ;;  %v999_v63 = vmul.f32 %v994_v54, %v2069_v10  ;;  %v998_v3 = vmul.f32 %v994_v54, %v2064_v8 }
 0x2bb   : > { %v818_v32 = vpop.permute.xlu2 %817  ;;  %v789_v0 = vpop.permute.xlu1 %788 }
 0x2bc   : > { %v797_v34 = vsel %vm796_vm11, %v789_v0, %v791_v29 }
 0x2bd   : > { %v801_v38 = vadd.f32 %v797_v34, %v774_v23  ;;  %956 = vrot.lane.b32.xlu2 %v945_v33, %s1726_s27  ;;  %954 = vrot.lane.b32.xlu1 %v944_v12, %s1726_s27  ;;  %s1743_s27 = smov 105  }
 0x2c0   : > { %v1021_v41 = vpop.permute.xlu0 %1020 }
 0x2c1   : > { %v1024_v16 = vmul.f32 %v1021_v41, %v2057_v59  ;;  %v1023_v11 = vmul.f32 %v1021_v41, %v2062_v7  ;;  %v1026_v6 = vmul.f32 %v1021_v41, %v2069_v10  ;;  %v1025_v17 = vmul.f32 %v1021_v41, %v2064_v8 }
 0x2c3   : > { %v822_v44 = vpop.permute.xlu2 %821  ;;  %v793_v45 = vpop.permute.xlu1 %792 }
 0x2c4   : > { %v798_v19 = vsel %vm796_vm11, %v793_v45, %v795_v5  ;;  %vm1228_vm11 = vcmask 883712  }
 0x2c5   : > { %v802_v36 = vadd.f32 %v798_v19, %v775_v31  ;;  %979 = vrot.lane.b32.xlu2 %v970_v43, %s1727_s29  ;;  %977 = vrot.lane.b32.xlu1 %v969_v13, %s1727_s29 }
 0x2c9   : > { %v1048_v22 = vpop.permute.xlu0 %1047 }
 0x2ca   : > { %v1051_v18 = vmul.f32 %v1048_v22, %v2057_v59  ;;  %v1050_v27 = vmul.f32 %v1048_v22, %v2062_v7  ;;  %v1053_v42 = vmul.f32 %v1048_v22, %v2069_v10  ;;  %v1052_v28 = vmul.f32 %v1048_v22, %v2064_v8 }
 0x2cb   : > { %v845_v48 = vpop.permute.xlu2 %844  ;;  %v816_v50 = vpop.permute.xlu1 %815 }
 0x2cc   : > { %v824_v51 = vsel %vm823_vm12, %v816_v50, %v818_v32 }
 0x2cd   : > { %v828_v53 = vadd.f32 %v824_v51, %v801_v38  ;;  %983 = vrot.lane.b32.xlu2 %v972_v25, %s1727_s29  ;;  %981 = vrot.lane.b32.xlu1 %v971_v35, %s1727_s29  ;;  %s1744_s29 = smov 104  }
 0x2d2   : > { %v1075_v24 = vpop.permute.xlu0 %1074 }
 0x2d3   : > { %v849_v56 = vpop.permute.xlu2 %848  ;;  %v820_v57 = vpop.permute.xlu1 %819  ;;  %v1078_v30 = vmul.f32 %v1075_v24, %v2057_v59  ;;  %v1077_v60 = vmul.f32 %v1075_v24, %v2062_v7  ;;  %v1080_v38 = vmul.f32 %v1075_v24, %v2069_v10  ;;  %v1079_v40 = vmul.f32 %v1075_v24, %v2064_v8 }
 0x2d4   : > { %v825_v58 = vsel %vm823_vm12, %v820_v57, %v822_v44  ;;  %vm1255_vm12 = vcmask 875520  }
 0x2d5   : > { %v829_v61 = vadd.f32 %v825_v58, %v802_v36  ;;  %1006 = vrot.lane.b32.xlu2 %v997_v47, %s1728_s8  ;;  %1004 = vrot.lane.b32.xlu1 %v996_v55, %s1728_s8 }
 0x2db   : > { %v843_v62 = vpop.permute.xlu1 %842  ;;  %v872_v4 = vpop.permute.xlu2 %871 }
 0x2dc   : > { %v851_v39 = vsel %vm850_vm13, %v843_v62, %v845_v48  ;;  %v1102_v31 = vpop.permute.xlu0 %1101 }
 0x2dd   : > { %v855_v9 = vadd.f32 %v851_v39, %v828_v53  ;;  %1010 = vrot.lane.b32.xlu2 %v999_v63, %s1728_s8  ;;  %1008 = vrot.lane.b32.xlu1 %v998_v3, %s1728_s8  ;;  %v1105_v19 = vmul.f32 %v1102_v31, %v2057_v59  ;;  %v1104_v36 = vmul.f32 %v1102_v31, %v2062_v7  ;;  %s1456_s8 = sshll.u32 %s1679_s21, 3  ;;  %s1360_s21 = sshll.u32 %s1836_s9, 4  ;;  %s1361_s21 = int_to_ptr.vmem [resolvable:$true] %s1360_s21 }
 0x2de   : > { %v1107_v54 = vmul.f32 %v1102_v31, %v2069_v10  ;;  %v1106_v47 = vmul.f32 %v1102_v31, %v2064_v8 }
 0x2e3   : > { %v847_v15 = vpop.permute.xlu1 %846  ;;  %v876_v52 = vpop.permute.xlu2 %875 }
 0x2e4   : > { %v852_v46 = vsel %vm850_vm13, %v847_v15, %v849_v56  ;;  %vm1282_vm13 = vcmask 867328  }
 0x2e5   : > { %v856_v49 = vadd.f32 %v852_v46, %v829_v61  ;;  %1033 = vrot.lane.b32.xlu2 %v1024_v16, %s1729_s10  ;;  %1031 = vrot.lane.b32.xlu1 %v1023_v11, %s1729_s10  ;;  %v1129_v34 = vpop.permute.xlu0 %1128 }
 0x2e6   : > { %v1132_v61 = vmul.f32 %v1129_v34, %v2057_v59  ;;  %v1131_v62 = vmul.f32 %v1129_v34, %v2062_v7  ;;  %v1134_v16 = vmul.f32 %v1129_v34, %v2069_v10  ;;  %v1133_v11 = vmul.f32 %v1129_v34, %v2064_v8 }
 0x2eb   : > { %v870_v2 = vpop.permute.xlu1 %869 }
 0x2ec   : > { %v878_v20 = vsel %vm877_vm14, %v870_v2, %v872_v4 }
 0x2ed   : > { %v882_v21 = vadd.f32 %v878_v20, %v855_v9  ;;  %1037 = vrot.lane.b32.xlu2 %v1026_v6, %s1729_s10  ;;  %1035 = vrot.lane.b32.xlu1 %v1025_v17, %s1729_s10  ;;  %v1735_v20 = vmov 21  }
 0x2ee   : > { %v1156_v48 = vpop.permute.xlu0 %1155  ;;  %1604 = vset.pattern.permute.xlu1 %v1735_v20 }
 0x2ef   : > { %v899_v29 = vpop.permute.xlu2 %898  ;;  %v1159_v2 = vmul.f32 %v1156_v48, %v2057_v59  ;;  %v1158_v17 = vmul.f32 %v1156_v48, %v2062_v7 }
 0x2f3   : > { %v874_v37 = vpop.permute.xlu1 %873 }
 0x2f4   : > { %v879_v1 = vsel %vm877_vm14, %v874_v37, %v876_v52  ;;  %v1161_v37 = vmul.f32 %v1156_v48, %v2069_v10  ;;  %vm1309_vm14 = vcmask 859136  }
 0x2f5   : > { %v883_v23 = vadd.f32 %v879_v1, %v856_v49  ;;  %1060 = vrot.lane.b32.xlu2 %v1051_v18, %s1730_s11  ;;  %1058 = vrot.lane.b32.xlu1 %v1050_v27, %s1730_s11  ;;  %v1160_v1 = vmul.f32 %v1156_v48, %v2064_v8 }
 0x2f7   : > { %v903_v26 = vpop.permute.xlu2 %902  ;;  %v2152_v53 = vpop.permute.xlu0 %1182 }
 0x2fd   : > { %1064 = vrot.lane.b32.xlu2 %v1053_v42, %s1730_s11  ;;  %1062 = vrot.lane.b32.xlu1 %v1052_v28, %s1730_s11 }
 0x2ff   : > { %v926_v5 = vpop.permute.xlu2 %925 }
 0x300   : > { %v2158_v63 = vpop.permute.xlu0 %1209 }
 0x301   : > { %v1212_v3 = vmul.f32 %v2158_v63, %v2062_v7  ;;  %v1215_v15 = vmul.f32 %v2158_v63, %v2069_v10 }
 0x303   : > { %1220 = vrot.lane.b32.xlu0 %v1212_v3, %s1734_s15 }
 0x305   : > { %1087 = vrot.lane.b32.xlu2 %v1078_v30, %s1731_s12  ;;  %1085 = vrot.lane.b32.xlu1 %v1077_v60, %s1731_s12  ;;  %v1185_v30 = vmul.f32 %v2152_v53, %v2062_v7 }
 0x307   : > { %v930_v32 = vpop.permute.xlu2 %929  ;;  %v897_v0 = vpop.permute.xlu1 %896 }
 0x308   : > { %v905_v33 = vsel %vm904_vm15, %v897_v0, %v899_v29 }
 0x309   : > { %v909_v12 = vadd.f32 %v905_v33, %v882_v21  ;;  %v1736_v21 = vmov 22   ;;  %v1188_v33 = vmul.f32 %v2152_v53, %v2069_v10 }
 0x30a   : > { %1605 = vset.pattern.permute.xlu2 %v1736_v21 }
 0x30b   : > { %1226 = vrot.lane.b32.xlu0 %v1215_v15, %s1734_s15 }
 0x30d   : > { %1091 = vrot.lane.b32.xlu2 %v1080_v38, %s1731_s12  ;;  %1089 = vrot.lane.b32.xlu1 %v1079_v40, %s1731_s12  ;;  %s1359_s12 = scalar_lea.hbm %s2268_s5, %s1456_s8 }
 0x30f   : > { %v953_v43 = vpop.permute.xlu2 %952  ;;  %v901_v13 = vpop.permute.xlu1 %900 }
 0x310   : > { %v906_v44 = vsel %vm904_vm15, %v901_v13, %v903_v26  ;;  %vm1336_vm15 = vcmask 850944  }
 0x311   : > { %v910_v45 = vadd.f32 %v906_v44, %v883_v23  ;;  %v1738_v23 = vmov 24  }
 0x312   : > { %1608 = vset.pattern.permute.xlu0 %v1738_v23 }
 0x315   : > { %1114 = vrot.lane.b32.xlu2 %v1105_v19, %s1732_s13  ;;  %1112 = vrot.lane.b32.xlu1 %v1104_v36, %s1732_s13  ;;  %v1740_v36 = vmov 23  }
 0x317   : > { %v957_v50 = vpop.permute.xlu2 %956  ;;  %v924_v25 = vpop.permute.xlu1 %923 }
 0x318   : > { %v932_v35 = vsel %vm931_vm0, %v924_v25, %v926_v5  ;;  %v1186_v5 = vmul.f32 %v2152_v53, %v2057_v59 }
 0x319   : > { %v936_v51 = vadd.f32 %v932_v35, %v909_v12  ;;  %v1187_v12 = vmul.f32 %v2152_v53, %v2064_v8  ;;  %v1213_v35 = vmul.f32 %v2158_v63, %v2057_v59 }
 0x31d   : > { %1118 = vrot.lane.b32.xlu2 %v1107_v54, %s1732_s13  ;;  %1116 = vrot.lane.b32.xlu1 %v1106_v47, %s1732_s13  ;;  %s1362_s13 = sshll.u32 %s1359_s12, 4  ;;  %s1363_s13 = int_to_ptr.hbm [resolvable:$true] %s1362_s13 }
 0x31f   : > { %v980_v55 = vpop.permute.xlu2 %979  ;;  %v928_v56 = vpop.permute.xlu1 %927 }
 0x320   : > { %v933_v57 = vsel %vm931_vm0, %v928_v56, %v930_v32 }
 0x321   : > { %v937_v58 = vadd.f32 %v933_v57, %v910_v45 }
 0x325   : > { %1141 = vrot.lane.b32.xlu2 %v1132_v61, %s1733_s14  ;;  %1139 = vrot.lane.b32.xlu1 %v1131_v62, %s1733_s14 }
 0x327   : > { %v984_v39 = vpop.permute.xlu2 %983  ;;  %v951_v4 = vpop.permute.xlu1 %950 }
 0x328   : > { %v959_v9 = vsel %vm958_vm1, %v951_v4, %v953_v43 }
 0x329   : > { %v963_v41 = vadd.f32 %v959_v9, %v936_v51  ;;  %v1214_v51 = vmul.f32 %v2158_v63, %v2064_v8 }
 0x32d   : > { %1145 = vrot.lane.b32.xlu2 %v1134_v16, %s1733_s14  ;;  %1143 = vrot.lane.b32.xlu1 %v1133_v11, %s1733_s14  ;;  %s1346_s14 = scalar_lea.sflag [#allocation4], %s229_s7 }
 0x32f   : > { %v1007_v46 = vpop.permute.xlu2 %1006  ;;  %v955_v49 = vpop.permute.xlu1 %954 }
 0x330   : > { %v960_v52 = vsel %vm958_vm1, %v955_v49, %v957_v50 }
 0x331   : > { %v964_v6 = vadd.f32 %v960_v52, %v937_v58 }
 0x335   : > { %1168 = vrot.lane.b32.xlu2 %v1159_v2, %s1737_s16  ;;  %1166 = vrot.lane.b32.xlu1 %v1158_v17, %s1737_s16 }
 0x337   : > { %v1011_v22 = vpop.permute.xlu2 %1010  ;;  %v978_v29 = vpop.permute.xlu1 %977 }
 0x338   : > { %v986_v18 = vsel %vm985_vm2, %v978_v29, %v980_v55 }
 0x339   : > { %v990_v27 = vadd.f32 %v986_v18, %v963_v41 }
 0x33d   : > { %1172 = vrot.lane.b32.xlu2 %v1161_v37, %s1737_s16  ;;  %1170 = vrot.lane.b32.xlu1 %v1160_v1, %s1737_s16 }
 0x33f   : > { %v1034_v26 = vpop.permute.xlu2 %1033  ;;  %v982_v24 = vpop.permute.xlu1 %981 }
 0x340   : > { %v987_v42 = vsel %vm985_vm2, %v982_v24, %v984_v39 }
 0x341   : > { %v991_v28 = vadd.f32 %v987_v42, %v964_v6 }
 0x345   : > { %1195 = vrot.lane.b32.xlu2 %v1186_v5, %s1739_s17  ;;  %1193 = vrot.lane.b32.xlu1 %v1185_v30, %s1739_s17 }
 0x347   : > { %v1038_v60 = vpop.permute.xlu2 %1037  ;;  %v1005_v31 = vpop.permute.xlu1 %1004 }
 0x348   : > { %v1013_v32 = vsel %vm1012_vm3, %v1005_v31, %v1007_v46 }
 0x349   : > { %v1017_v0 = vadd.f32 %v1013_v32, %v990_v27 }
 0x34d   : > { %1199 = vrot.lane.b32.xlu2 %v1188_v33, %s1739_s17  ;;  %1197 = vrot.lane.b32.xlu1 %v1187_v12, %s1739_s17 }
 0x34f   : > { %v1009_v34 = vpop.permute.xlu1 %1008  ;;  %v1061_v40 = vpop.permute.xlu2 %1060 }
 0x350   : > { %v1014_v38 = vsel %vm1012_vm3, %v1009_v34, %v1011_v22 }
 0x351   : > { %v1018_v43 = vadd.f32 %v1014_v38, %v991_v28 }
 0x355   : > { %1236 = vperm.xlu1 %1604, %v2043_v14   ;;  %1263 = vperm.xlu2 %1605, %v2043_v14  }
 0x357   : > { %v1032_v13 = vpop.permute.xlu1 %1031  ;;  %v1065_v19 = vpop.permute.xlu2 %1064 }
 0x358   : > { %v1040_v44 = vsel %vm1039_vm4, %v1032_v13, %v1034_v26 }
 0x359   : > { %v1044_v45 = vadd.f32 %v1040_v44, %v1017_v0 }
 0x35d   : > { %1606 = vset.pattern.permute.xlu1 %v1740_v36  ;;  %1607 = vset.pattern.permute.xlu2 %v1738_v23 }
 0x35e   : > { %1290 = vperm.xlu1 %1606, %v2043_v14   ;;  %1317 = vperm.xlu2 %1607, %v2043_v14  }
 0x35f   : > { %v1036_v48 = vpop.permute.xlu1 %1035  ;;  %v1088_v53 = vpop.permute.xlu2 %1087 }
 0x360   : > { %v1041_v50 = vsel %vm1039_vm4, %v1036_v48, %v1038_v60 }
 0x361   : > { %v1045_v25 = vadd.f32 %v1041_v50, %v1018_v43 }
 0x366   : > { %1222 = vrot.lane.b32.xlu1 %v1213_v35, %s1734_s15  ;;  %1224 = vrot.lane.b32.xlu2 %v1214_v51, %s1734_s15  ;;  %s1623_s15 = sshra.s32 %s1363_s13, 4  ;;  %s1624_s15 = int_to_ptr.hbm [resolvable:$true] %s1623_s15 }
 0x367   : > { %v1059_v54 = vpop.permute.xlu1 %1058  ;;  %v1092_v56 = vpop.permute.xlu2 %1091  ;;  %s1625_s16 = scalar_lea.hbm %s1624_s15, 16  ;;  %p1630_p1 = scmp.lt.s32.totalorder %s1624_s15, %s2268_s5 }
 0x368   : > { %v1067_v47 = vsel %vm1066_vm5, %v1059_v54, %v1061_v40  ;;  %p1626_p12 = scmp.ne.s32.totalorder %s1624_s15, %s1625_s16 }
 0x369   : > { %v1071_v55 = vadd.f32 %v1067_v47, %v1044_v45 }
 0x36a   : > { %p1627_p13 = pnand %p1626_p12, %p1818_p4 }
 0x36c   : > { %p1628_p0 = pneg %p1627_p13 }
 0x36f   : > { %v1063_v14 = vpop.permute.xlu1 %1062  ;;  %v1115_v3 = vpop.permute.xlu2 %1114 }
 0x370   : > { %v1068_v57 = vsel %vm1066_vm5, %v1063_v14, %v1065_v19 }
 0x371   : > { %v1072_v58 = vadd.f32 %v1068_v57, %v1045_v25 }
 0x375   : > { %v1221_v57 = vpop.permute.xlu0 %1220 }
 0x377   : > { %v1086_v61 = vpop.permute.xlu1 %1085  ;;  %v1119_v41 = vpop.permute.xlu2 %1118 }
 0x378   : > { %v1094_v62 = vsel %vm1093_vm6, %v1086_v61, %v1088_v53 }
 0x379   : > { %v1098_v39 = vadd.f32 %v1094_v62, %v1071_v55 }
 0x37d   : > { %v1227_v61 = vpop.permute.xlu0 %1226 }
 0x37f   : > { %v1090_v4 = vpop.permute.xlu1 %1089  ;;  %v1142_v46 = vpop.permute.xlu2 %1141 }
 0x380   : > { %v1095_v63 = vsel %vm1093_vm6, %v1090_v4, %v1092_v56 }
 0x381   : > { %v1099_v9 = vadd.f32 %v1095_v63, %v1072_v58 }
 0x387   : > { %v1113_v16 = vpop.permute.xlu1 %1112  ;;  %v1146_v6 = vpop.permute.xlu2 %1145 }
 0x388   : > { %v1121_v11 = vsel %vm1120_vm7, %v1113_v16, %v1115_v3 }
 0x389   : > { %v1125_v15 = vadd.f32 %v1121_v11, %v1098_v39 }
 0x38f   : > { %v1117_v49 = vpop.permute.xlu1 %1116  ;;  %v1169_v18 = vpop.permute.xlu2 %1168 }
 0x390   : > { %v1122_v52 = vsel %vm1120_vm7, %v1117_v49, %v1119_v41 }
 0x391   : > { %v1126_v2 = vadd.f32 %v1122_v52, %v1099_v9 }
 0x397   : > { %v1140_v17 = vpop.permute.xlu1 %1139  ;;  %v1173_v26 = vpop.permute.xlu2 %1172 }
 0x398   : > { %v1148_v20 = vsel %vm1147_vm8, %v1140_v17, %v1142_v46 }
 0x399   : > { %v1152_v21 = vadd.f32 %v1148_v20, %v1125_v15 }
 0x39f   : > { %v1144_v22 = vpop.permute.xlu1 %1143  ;;  %v1196_v5 = vpop.permute.xlu2 %1195 }
 0x3a0   : > { %v1149_v29 = vsel %vm1147_vm8, %v1144_v22, %v1146_v6 }
 0x3a1   : > { %v1153_v27 = vadd.f32 %v1149_v29, %v1126_v2 }
 0x3a7   : > { %v1167_v37 = vpop.permute.xlu1 %1166  ;;  %v1200_v32 = vpop.permute.xlu2 %1199 }
 0x3a8   : > { %v1175_v1 = vsel %vm1174_vm9, %v1167_v37, %v1169_v18 }
 0x3a9   : > { %v1179_v23 = vadd.f32 %v1175_v1, %v1152_v21 }
 0x3af   : > { %v1171_v24 = vpop.permute.xlu1 %1170  ;;  %v1264_v13 = vpop.permute.xlu2 %1263 }
 0x3b0   : > { %v1176_v42 = vsel %vm1174_vm9, %v1171_v24, %v1173_v26  ;;  %v1267_v44 = vmul.f32 %v1264_v13, %v2057_v59  ;;  %v1266_v45 = vmul.f32 %v1264_v13, %v2062_v7  ;;  %v1269_v48 = vmul.f32 %v1264_v13, %v2069_v10 }
 0x3b1   : > { %v1180_v28 = vadd.f32 %v1176_v42, %v1153_v27  ;;  %v1268_v25 = vmul.f32 %v1264_v13, %v2064_v8 }
 0x3b7   : > { %v1194_v30 = vpop.permute.xlu1 %1193 }
 0x3b8   : > { %v1202_v60 = vsel %vm1201_vm10, %v1194_v30, %v1196_v5  ;;  %v1318_v54 = vpop.permute.xlu2 %1317 }
 0x3b9   : > { %v2192_v31 = vadd.f32 %v1202_v60, %v1179_v23  ;;  %v1321_v47 = vmul.f32 %v1318_v54, %v2057_v59  ;;  %v1322_v55 = vmul.f32 %v1318_v54, %v2064_v8  ;;  %v1320_v56 = vmul.f32 %v1318_v54, %v2062_v7 }
 0x3ba   : > { %v1323_v14 = vmul.f32 %v1318_v54, %v2069_v10 }
 0x3bf   : > { %v1198_v0 = vpop.permute.xlu1 %1197 }
 0x3c0   : > { %v1203_v33 = vsel %vm1201_vm10, %v1198_v0, %v1200_v32  ;;  %v1225_v58 = vpop.permute.xlu2 %1224 }
 0x3c1   : > { %v2194_v12 = vadd.f32 %v1203_v33, %v1180_v28  ;;  %v1230_v20 = vsel %vm1228_vm11, %v1225_v58, %v1227_v61 }
 0x3c3   : > { %v1234_v37 = vadd.f32 %v1230_v20, %v2194_v12 }
 0x3c7   : > { %v1237_v34 = vpop.permute.xlu1 %1236 }
 0x3c8   : > { %v1241_v38 = vmul.f32 %v1237_v34, %v2064_v8  ;;  %v1240_v40 = vmul.f32 %v1237_v34, %v2057_v59  ;;  %v1239_v43 = vmul.f32 %v1237_v34, %v2062_v7  ;;  %v1242_v19 = vmul.f32 %v1237_v34, %v2069_v10 }
 0x3ca   : > { %1251 = vrot.lane.b32.xlu0 %v1241_v38, %s1741_s24  ;;  %1249 = vrot.lane.b32.xlu2 %v1240_v40, %s1741_s24 }
 0x3cb   : > { %1247 = vrot.lane.b32.xlu1 %v1239_v43, %s1741_s24 }
 0x3d0   : > { %v1291_v36 = vpop.permute.xlu1 %1290 }
 0x3d1   : > { %v1293_v50 = vmul.f32 %v1291_v36, %v2062_v7  ;;  %v1295_v35 = vmul.f32 %v1291_v36, %v2064_v8  ;;  %v1296_v51 = vmul.f32 %v1291_v36, %v2069_v10  ;;  %v1294_v53 = vmul.f32 %v1291_v36, %v2057_v59 }
 0x3d2   : > { %1276 = vrot.lane.b32.xlu0 %v1267_v44, %s1742_s25  ;;  %1274 = vrot.lane.b32.xlu2 %v1266_v45, %s1742_s25 }
 0x3d3   : > { %1253 = vrot.lane.b32.xlu1 %v1242_v19, %s1741_s24 }
 0x3d8   : > { %v1223_v62 = vpop.permute.xlu1 %1222 }
 0x3d9   : > { %v1229_v11 = vsel %vm1228_vm11, %v1221_v57, %v1223_v62 }
 0x3da   : > { %1280 = vrot.lane.b32.xlu2 %v1269_v48, %s1742_s25  ;;  %1301 = vrot.lane.b32.xlu0 %v1293_v50, %s1743_s27  ;;  %v1233_v46 = vadd.f32 %v1229_v11, %v2192_v31 }
 0x3db   : > { %1278 = vrot.lane.b32.xlu1 %v1268_v25, %s1742_s25  ;;  %s1629_s25 = scalar_lea.hbm %s2268_s5, 64 }
 0x3dc   : > { %p1631_p2 = scmp.lt.s32.totalorder %s1629_s25, %s1625_s16 }
 0x3de   : > { %p1632_p3 = por %p1631_p2, %p1630_p1 }
 0x3e0   : > { %p1633_p5 = pnand %p1632_p3, %p1628_p0 }
 0x3e2   : > { %1305 = vrot.lane.b32.xlu2 %v1295_v35, %s1743_s27  ;;  %1307 = vrot.lane.b32.xlu0 %v1296_v51, %s1743_s27 }
 0x3e3   : > { %1303 = vrot.lane.b32.xlu1 %v1294_v53, %s1743_s27 }
 0x3ea   : > { %1330 = vrot.lane.b32.xlu2 %v1321_v47, %s1744_s29  ;;  %1332 = vrot.lane.b32.xlu0 %v1322_v55, %s1744_s29 }
 0x3eb   : > { %1328 = vrot.lane.b32.xlu1 %v1320_v56, %s1744_s29 }
 0x3f3   : > { %1334 = vrot.lane.b32.xlu1 %v1323_v14, %s1744_s29 }
 0x424   : > { %v1250_v3 = vpop.permute.xlu2 %1249 }
 0x42c   : > { %v1275_v63 = vpop.permute.xlu2 %1274 }
 0x434   : > { %v1281_v8 = vpop.permute.xlu2 %1280 }
 0x43c   : > { %v1252_v39 = vpop.permute.xlu0 %1251  ;;  %v1306_v16 = vpop.permute.xlu2 %1305 }
 0x43d   : > { %v1248_v4 = vpop.permute.xlu1 %1247 }
 0x43e   : > { %v1256_v15 = vsel %vm1255_vm12, %v1248_v4, %v1250_v3 }
 0x43f   : > { %v1260_v52 = vadd.f32 %v1256_v15, %v1233_v46 }
 0x444   : > { %v1277_v9 = vpop.permute.xlu0 %1276  ;;  %v1331_v21 = vpop.permute.xlu2 %1330 }
 0x445   : > { %v1254_v59 = vpop.permute.xlu1 %1253  ;;  %v1283_v49 = vsel %vm1282_vm13, %v1275_v63, %v1277_v9 }
 0x446   : > { %v1287_v6 = vadd.f32 %v1283_v49, %v1260_v52  ;;  %v1257_v18 = vsel %vm1255_vm12, %v1252_v39, %v1254_v59 }
 0x447   : > { %v1261_v26 = vadd.f32 %v1257_v18, %v1234_v37 }
 0x44c   : > { %v1302_v7 = vpop.permute.xlu0 %1301 }
 0x44d   : > { %v1279_v41 = vpop.permute.xlu1 %1278 }
 0x44e   : > { %v1284_v23 = vsel %vm1282_vm13, %v1279_v41, %v1281_v8 }
 0x44f   : > { %v1288_v42 = vadd.f32 %v1284_v23, %v1261_v26 }
 0x454   : > { %v1308_v17 = vpop.permute.xlu0 %1307 }
 0x455   : > { %v1304_v10 = vpop.permute.xlu1 %1303  ;;  %v1311_v24 = vsel %vm1309_vm14, %v1306_v16, %v1308_v17 }
 0x456   : > { %v1310_v2 = vsel %vm1309_vm14, %v1302_v7, %v1304_v10  ;;  %v1315_v28 = vadd.f32 %v1311_v24, %v1288_v42 }
 0x457   : > { %v1314_v22 = vadd.f32 %v1310_v2, %v1287_v6 }
 0x45c   : > { %v1333_v5 = vpop.permute.xlu0 %1332 }
 0x45d   : > { %v1329_v29 = vpop.permute.xlu1 %1328 }
 0x45e   : > { %v1337_v27 = vsel %vm1336_vm15, %v1329_v29, %v1331_v21 }
 0x45f   : > { %v1341_v1 = vadd.f32 %v1337_v27, %v1314_v22 }
 0x461   : > { %1343 = vst [vmem:[%s1836_s9] sm:$0xff] %v1341_v1 }
 0x465   : > { %v1335_v30 = vpop.permute.xlu1 %1334 }
 0x466   : > { %v1338_v60 = vsel %vm1336_vm15, %v1333_v5, %v1335_v30 }
 0x467   : > { %v1342_v31 = vadd.f32 %v1338_v60, %v1315_v28 }
 0x469   : > { %1344 = vst [vmem:[%s1836_s9 + $0x8] sm:$0xff] %v1342_v31 }
 0x46a   : > { %1636 = shalt.err (!%p1633_p5)
}
 0x46b   : > { %s1745_s7 = smov 128   ;;  %s1746_s9 = smov 512  }
 0x46c   : > { %s1747_s8 = smov 8  }
 0x46d   : > { %1459 = dma.vmem_to_hbm [thread:$0]  (%p1818_p4), %s1361_s21, 256, %s1363_s13, %s1346_s14, %s1745_s7, %s1746_s9, %s1747_s8  }
 0x46e PF: > { %p1465_p6 = scmp.ge.s32.totalorder %s1687_s23, 2  ;;  %s1377_s10 = sand.u32 1, %s1667_s18  }
 0x46f   : > { %s1378_s11 = scalar_lea.sflag [#allocation4], %s1377_s10 }
 0x470   : > { %p1462_p7 = pnand %p1465_p6, %p1825_p8 }
 0x472   : > { %p1463_p9 = pneg %p1462_p7 }
 0x474   : > { %1662 = dma.done.wait (%p1463_p9), %s1378_s11, 256  }
 0x475   : > { %1664 = vsyncadd (%p1463_p9), %s1378_s11, 4294967040  ;;  %s18_s23 = sadd.s32 1, %s1687_s23   ;;  %s2273_s18 = smov %s1671_s19 }
 0x476   : > { %p15_p10 = scmp.ge.s32.totalorder %s18_s23, 6   ;;  %s2274_s19 = smov %s1675_s20 }
 0x477   : > { %s2275_s20 = smov %s1831_s6  ;;  %s2276_s21 = smov %s1683_s22 }
 0x478   : > { %s2277_s22 = smov %s2279_s26  ;;  %17 = sbr.rel (!%p15_p10) target bundleno = 4 (0x4), region = 80 }
 0x47d   :  { %1384 = vsyncpa [#allocation4], 1 }
 0x47e   :  { %1386 = vsyncpa [#allocation4 + $0x1], 1 }

</bundles_post_ra>
